<compile_context>
chip_gen: v5e
topology: v5e:2x2
jax: 0.10.0
libtpu: 0.0.40
codegen_flags: <defaults>
</compile_context>

<pallas_src>
import functools

import jax
import jax.numpy as jnp
from jax import lax
from jax.experimental import pallas as pl
from jax.experimental.pallas import tpu as pltpu


# --------------------------------------------------------------------------- #
# Kernel
# --------------------------------------------------------------------------- #
def _forward_attention_kernel(
    # per-step inputs (one batch tile each)
    q_ref,        # [Bt, Dq]  f32   query (attention rnn hidden state)
    aw_ref,       # [Bt, Tp]  f32   previous attention weights      (conv ch 0)
    awc_ref,      # [Bt, Tp]  f32   cumulative attention weights    (conv ch 1)
    alpha_ref,    # [Bt, Tp]  f32   previous forward-attention alpha
    u_ref,        # [Bt, 1]   f32   transition agent probability
    # per-utterance operands (prepared once, streamed as bf16)
    mem_ref,      # [Bt, Tp, De] bf16  memory (encoder outputs)
    pmt_ref,      # [Bt, Da, Tp] bf16  processed memory, transposed (T on lanes)
    len_ref,      # [Bt, 1]  int32     valid length per row (suffix mask)
    # weights (whole tensors, constant index_map)
    wq_ref,       # [Dq, Da]  f32   query_layer weight (transposed)
    weff_ref,     # [Da, 2K]  f32   fused location conv+dense weight
    v_ref,        # [Da, 1]   f32   v projection (column)
    wtac_ref,     # [1, De]   f32   transition agent weight (context part)
    wtaq_ref,     # [1, Dq]   f32   transition agent weight (query part)
    bta_ref,      # [1, 1]    f32   transition agent bias
    # outputs
    ctx_out,      # [Bt, De]        attention context
    alpha_out,    # [Bt, Tp]        new attention weights / alpha
    awc_out,      # [Bt, Tp]        new cumulative attention weights
    u_out,        # [Bt, 1]         new transition agent probability
    *, kernel_size, transition_agent_bias):
    q = q_ref[...]
    aw = aw_ref[...]
    awc = awc_ref[...]
    alpha_prev = alpha_ref[...]
    u = u_ref[...]

    Bt, Tp = aw.shape
    De = mem_ref.shape[2]
    K = kernel_size
    pad = (K - 1) // 2

    col = lax.broadcasted_iota(jnp.int32, (Bt, Tp), 1)
    # Mask rebuilt in-kernel from per-row lengths (suffix mask, standard Tacotron),
    # removing the [B, Tp] int32 mask HBM stream.
    masked = col >= len_ref[...]                               # True = padded pos

    # --- processed query: [Bt, Da] on the MXU ---
    pq = jnp.dot(q, wq_ref[...], preferred_element_type=jnp.float32)

    # --- fused location conv + dense ---
    # taps[b, 2k+c, t] = x_c[b, t + k - pad] (zero-padded outside [0, Tp)); the conv
    # and the F->Da dense layer are folded into one Weff[Da, 2K] MXU contraction.
    def tap(x, off):
        if off == 0:
            return x
        r = pltpu.roll(x, (-off) % Tp, 1)                      # r[t] = x[t + off]
        if off > 0:                                            # single-sided bound check
            return jnp.where(col < Tp - off, r, 0.0)
        return jnp.where(col >= -off, r, 0.0)

    taps_list = []
    for k in range(K):                                         # static, small K
        off = k - pad
        taps_list.append(tap(aw, off))                         # channel 0 (prev)
        taps_list.append(tap(awc, off))                        # channel 1 (cum)
    taps = jnp.stack(taps_list, axis=1)                        # [Bt, 2K, Tp]

    weff_b = jnp.broadcast_to(weff_ref[...][None, :, :],       # tiny [Da, 2K] weight
                              (Bt,) + weff_ref.shape)
    proc_t = jnp.einsum('baj,bjt->bat', weff_b, taps,
                        preferred_element_type=jnp.float32)    # [Bt, Da, Tp]

    # --- alignment energies (transposed [Bt, Da, Tp] layout, T stays on lanes) ---
    e = jnp.tanh(pq[:, :, None] + proc_t + pmt_ref[...].astype(jnp.float32))
    energies = jnp.sum(e * v_ref[...][None, :, :], axis=1)     # [Bt, Tp]

    # --- mask + softmax over T (finite sentinel: fully-masked rows stay NaN-free) ---
    energies = jnp.where(masked, jnp.float32(-1e30), energies)
    m = jnp.max(energies, axis=1, keepdims=True)
    ex = jnp.exp(energies - m)
    attn = ex * pl.reciprocal(jnp.sum(ex, axis=1, keepdims=True), approx=True)

    # --- cumulative attention update ---
    awc_out[...] = awc + attn

    # --- forward attention recursion (shift-by-one via XLU roll, col 0 zeroed) ---
    shifted = jnp.where(col == 0, 0.0, pltpu.roll(alpha_prev, 1, 1))
    alpha_new = ((1.0 - u) * alpha_prev + u * shifted + 1e-8) * attn
    # TODO(synk): forward_attn_mask inference-time state masking (per-row argmax window) not implemented.
    alpha_new = alpha_new * pl.reciprocal(
        jnp.sum(alpha_new, axis=1, keepdims=True), approx=True)
    alpha_out[...] = alpha_new

    # --- attention context: bf16 MXU bmm with f32 accumulation ---
    ctx = jnp.einsum('bqt,bte->bqe',
                     alpha_new[:, None, :].astype(mem_ref.dtype), mem_ref[...],
                     preferred_element_type=jnp.float32).reshape(Bt, De)
    ctx_out[...] = ctx

    # --- transition agent: N=1 projection = VPU multiply + lane reduce ---
    ta = (jnp.sum(ctx * wtac_ref[...], axis=1, keepdims=True)
          + jnp.sum(q * wtaq_ref[...], axis=1, keepdims=True)
          + bta_ref[...] + transition_agent_bias)
    u_out[...] = jax.nn.sigmoid(ta)


# --------------------------------------------------------------------------- #
# One-time (per-utterance / per-model) preparation — hoisted out of the decode loop
# --------------------------------------------------------------------------- #
def prepare_forward_attention(memory, processed_memory, mask_bool,
                              batch_tile=None, stream_dtype=jnp.bfloat16):
    """Pad T to a lane-dense multiple of 128, pad B to the batch tile, transpose
    processed_memory to [B, Da, Tp], cast the big streams to bf16 and convert the
    (suffix) mask to per-row lengths.  Call ONCE, outside the decoder loop."""
    B, T, De = memory.shape
    Da = processed_memory.shape[2]

    if batch_tile is None:
        batch_tile = 8                     # sublane-aligned minimum
        for cand in (32, 16):              # grow tile to amortize per-step overhead
            if B >= 2 * cand:              # ...but keep >= 2 grid steps (v7x: 2 TCs)
                batch_tile = cand
                break
    bt = int(batch_tile)
    Bp = ((B + bt - 1) // bt) * bt
    Tp = max(128, ((T + 127) // 128) * 128)

    mem_p = jnp.pad(memory, ((0, Bp - B), (0, Tp - T), (0, 0))).astype(stream_dtype)
    pmt_p = jnp.pad(jnp.transpose(processed_memory, (0, 2, 1)),
                    ((0, Bp - B), (0, 0), (0, Tp - T))).astype(stream_dtype)
    lengths = jnp.sum(jnp.logical_not(mask_bool), axis=1).astype(jnp.int32)
    lengths = jnp.pad(lengths, (0, Bp - B)).reshape(Bp, 1)

    return dict(memory=mem_p, processed_memory_t=pmt_p, lengths=lengths,
                B=B, T=T, De=De, Da=Da, Bp=Bp, Tp=Tp, bt=bt)


def prepare_forward_attention_params(Wq, Wconv, Wdense, Wv, Wta, bta, embedding_dim):
    """One-time weight folding (PyTorch layouts in, kernel layouts out)."""
    _, _, K = Wconv.shape
    Da = Wdense.shape[0]
    De = int(embedding_dim)
    # Fuse the location conv (2 in-channels, F filters, width K) with the F->Da dense:
    #   Weff[a, 2k + c] = sum_f Wdense[a, f] * Wconv[f, c, k]
    weff = jnp.einsum('af,fck->akc', Wdense, Wconv).reshape(Da, 2 * K)
    return dict(wq=jnp.asarray(Wq).T,              # [Dq, Da]
                weff=weff,                          # [Da, 2K]
                v=jnp.asarray(Wv).T,                # [Da, 1]
                wtac=jnp.asarray(Wta)[:, :De],      # [1, De]
                wtaq=jnp.asarray(Wta)[:, De:],      # [1, Dq]
                bta=jnp.asarray(bta).reshape(1, 1), # [1, 1]
                K=int(K))


def pad_attention_state(prep, attention_weights, attention_weights_cum, alpha, u):
    """Pad [B, T] attention state to the kernel's [Bp, Tp] layout (do once; the
    step function keeps the state padded across decoder steps)."""
    Bp, Tp = prep["Bp"], prep["Tp"]
    B, T = attention_weights.shape
    pad2 = lambda x: jnp.pad(x, ((0, Bp - B), (0, Tp - T)))
    return (pad2(attention_weights), pad2(attention_weights_cum), pad2(alpha),
            jnp.pad(u, ((0, Bp - B), (0, 0))))


# --------------------------------------------------------------------------- #
# Per-step wrapper
# --------------------------------------------------------------------------- #
def forward_attention_step(prep, params, query,
                           attention_weights, attention_weights_cum, alpha, u,
                           transition_agent_bias=0.0):
    """One decoder step of ForwardAttention.

    `query` is [B, Dq]; the attention state tensors must already be in the padded
    [Bp, Tp] / [Bp, 1] layout (see pad_attention_state) and are returned padded so
    they feed straight back into the next step with zero per-step re-layout cost.
    Returns (context[B, De], alpha[Bp, Tp], attention_weights_cum[Bp, Tp], u[Bp, 1]).
    """
    B, Dq = query.shape
    Bp, Tp, bt = prep["Bp"], prep["Tp"], prep["bt"]
    De, Da = prep["De"], prep["Da"]
    K = params["K"]

    if B != Bp:                                   # tiny per-step pad (query only)
        query = jnp.pad(query, ((0, Bp - B), (0, 0)))

    nb = Bp // bt
    bmap2 = lambda b: (b, 0)
    bmap3 = lambda b: (b, 0, 0)
    wmap = lambda b: (0, 0)

    grid_spec = pltpu.PrefetchScalarGridSpec(
        num_scalar_prefetch=0,
        grid=(nb,),
        in_specs=[
            pl.BlockSpec((bt, Dq), bmap2),          # query
            pl.BlockSpec((bt, Tp), bmap2),          # attention weights (prev)
            pl.BlockSpec((bt, Tp), bmap2),          # attention weights (cum)
            pl.BlockSpec((bt, Tp), bmap2),          # alpha
            pl.BlockSpec((bt, 1), bmap2),           # u
            pl.BlockSpec((bt, Tp, De), bmap3),      # memory (bf16)
            pl.BlockSpec((bt, Da, Tp), bmap3),      # processed memory^T (bf16)
            pl.BlockSpec((bt, 1), bmap2),           # lengths
            pl.BlockSpec((Dq, Da), wmap),           # Wq^T
            pl.BlockSpec((Da, 2 * K), wmap),        # fused conv+dense weight
            pl.BlockSpec((Da, 1), wmap),            # v
            pl.BlockSpec((1, De), wmap),            # ta weight (ctx part)
            pl.BlockSpec((1, Dq), wmap),            # ta weight (query part)
            pl.BlockSpec((1, 1), wmap),             # ta bias
        ],
        out_specs=[
            pl.BlockSpec((bt, De), bmap2),          # attention context
            pl.BlockSpec((bt, Tp), bmap2),          # new alpha
            pl.BlockSpec((bt, Tp), bmap2),          # new cumulative weights
            pl.BlockSpec((bt, 1), bmap2),           # new u
        ],
    )
    out_shape = (
        jax.ShapeDtypeStruct((Bp, De), jnp.float32),
        jax.ShapeDtypeStruct((Bp, Tp), jnp.float32),
        jax.ShapeDtypeStruct((Bp, Tp), jnp.float32),
        jax.ShapeDtypeStruct((Bp, 1), jnp.float32),
    )

    # VMEM limit sized from the actual tile footprint (double-buffered streams and
    # in-kernel intermediates), clamped so it also fits v7x's 64 MiB VMEM.
    stream_bytes = (bt * Dq * 4 + 3 * bt * Tp * 4 + 2 * bt * 4
                    + bt * Tp * De * 2 + bt * Da * Tp * 2)
    out_bytes = bt * De * 4 + 2 * bt * Tp * 4 + bt * 4
    interm_bytes = 3 * bt * Da * Tp * 4 + bt * max(16, 2 * K) * Tp * 4
    tile_bytes = 2 * (stream_bytes + out_bytes) + interm_bytes
    vmem_limit = int(min(96 * 2 ** 20, max(32 * 2 ** 20, 2 * tile_bytes)))

    fn = pl.pallas_call(
        functools.partial(_forward_attention_kernel,
                          kernel_size=K,
                          transition_agent_bias=float(transition_agent_bias)),
        grid_spec=grid_spec,
        out_shape=out_shape,
        compiler_params=pltpu.CompilerParams(
            dimension_semantics=("parallel",),
            vmem_limit_bytes=vmem_limit),
    )
    ctx, alpha_new, awc_new, u_new = fn(
        query, attention_weights, attention_weights_cum, alpha, u,
        prep["memory"], prep["processed_memory_t"], prep["lengths"],
        params["wq"], params["weff"], params["v"],
        params["wtac"], params["wtaq"], params["bta"])
    return ctx[:B], alpha_new, awc_new, u_new


# --------------------------------------------------------------------------- #
# Pure-JAX reference (mirror of the PyTorch forward) for verification
# --------------------------------------------------------------------------- #
def forward_attention_reference(query, memory, pm, aw, awc, alpha, u, mask_bool,
                                Wq, Wconv, Wdense, Wv, Wta, bta, tab):
    K = Wconv.shape[-1]
    pad = (K - 1) // 2
    aw_cat = jnp.stack([aw, awc], axis=1)                                     # [B,2,T]
    conv = lax.conv_general_dilated(aw_cat, Wconv, (1,), [(pad, pad)],
                                    dimension_numbers=('NCH', 'OIH', 'NCH'))  # [B,F,T]
    proc_attn = jnp.einsum('bft,af->bta', conv, Wdense)                       # [B,T,Da]
    pq = (query @ Wq.T)[:, None, :]
    energies = jnp.squeeze(jnp.tanh(pq + proc_attn + pm) @ Wv.T, -1)          # [B,T]
    energies = jnp.where(mask_bool, -jnp.inf, energies)
    attn = jax.nn.softmax(energies, axis=1)
    awc_new = awc + attn
    shifted = jnp.pad(alpha[:, :-1], ((0, 0), (1, 0)))
    a = ((1.0 - u) * alpha + u * shifted + 1e-8) * attn
    a = a / jnp.sum(a, axis=1, keepdims=True)
    ctx = jnp.squeeze(a[:, None, :] @ memory, 1)
    ta_in = jnp.concatenate([ctx, query], axis=-1)
    u_new = jax.nn.sigmoid(ta_in @ Wta.T + bta + tab)
    return ctx, a, awc_new, u_new


if __name__ == "__main__":
    B, T = 2, 16
    Dq, De, Da = 32, 16, 32          # attention_rnn_dim, embedding_dim, attention_dim
    n_filt, K = 8, 5                 # attention_location_n_filters / kernel_size
    tab = 0.0                        # transition_agent_bias

    keys = jax.random.split(jax.random.PRNGKey(0), 12)
    # parameters (deterministic, PyTorch weight conventions)
    Wm = 0.1 * jax.random.normal(keys[0], (Da, De), jnp.float32)        # memory_layer
    Wq = 0.1 * jax.random.normal(keys[1], (Da, Dq), jnp.float32)        # query_layer
    Wv = 0.1 * jax.random.normal(keys[2], (1, Da), jnp.float32)         # v
    Wconv = 0.1 * jax.random.normal(keys[3], (n_filt, 2, K), jnp.float32)
    Wdense = 0.1 * jax.random.normal(keys[4], (Da, n_filt), jnp.float32)
    Wta = 0.1 * jax.random.normal(keys[5], (1, De + Dq), jnp.float32)   # ta (Linear)
    bta = 0.1 * jax.random.normal(keys[6], (1,), jnp.float32)

    # inputs + attention state (as if mid-decoding, to exercise the location conv)
    query = jax.random.normal(keys[7], (B, Dq), jnp.float32)
    memory = jax.random.normal(keys[8], (B, T, De), jnp.float32)
    processed_memory = jnp.einsum('btd,ad->bta', memory, Wm)            # memory_layer(memory)
    aw = jax.nn.softmax(jax.random.normal(keys[9], (B, T), jnp.float32), axis=1)
    awc = aw
    alpha = jax.nn.softmax(jax.random.normal(keys[10], (B, T), jnp.float32), axis=1)
    u = 0.5 * jnp.ones((B, 1), jnp.float32)
    lengths = jnp.array([T, T - 4])
    mask = jnp.arange(T)[None, :] >= lengths[:, None]                   # True = padded

    # one-time prep (hoisted out of the decoder loop)
    prep = prepare_forward_attention(memory, processed_memory, mask)
    params = prepare_forward_attention_params(Wq, Wconv, Wdense, Wv, Wta, bta, De)
    aw_p, awc_p, al_p, u_p = pad_attention_state(prep, aw, awc, alpha, u)

    # one decoder step
    ctx, alpha_new, awc_new, u_new = forward_attention_step(
        prep, params, query, aw_p, awc_p, al_p, u_p, tab)
    outs = (ctx, alpha_new[:B, :T], awc_new[:B, :T], u_new[:B])
    outs = jax.block_until_ready(outs)

    refs = forward_attention_reference(query, memory, processed_memory, aw, awc,
                                       alpha, u, mask, Wq, Wconv, Wdense, Wv, Wta, bta, tab)
    # bf16 streaming of memory / processed_memory + approx reciprocals => loosened tolerance
    for got, ref in zip(outs, refs):
        assert got.shape == ref.shape
        assert jnp.allclose(got, ref, atol=2e-2, rtol=2e-2), (got, ref)

    print("KERNEL_OK")
</pallas_src>

<mosaic_0001>
module attributes {stable_mosaic.version = 11 : i64} {
  func.func @_forward_attention_kernel(%arg0: i32, %arg1: memref<8x32xf32, #tpu.memory_space<vmem>>, %arg2: memref<8x128xf32, #tpu.memory_space<vmem>>, %arg3: memref<8x128xf32, #tpu.memory_space<vmem>>, %arg4: memref<8x128xf32, #tpu.memory_space<vmem>>, %arg5: memref<8x1xf32, #tpu.memory_space<vmem>>, %arg6: memref<8x128x16xbf16, #tpu.memory_space<vmem>>, %arg7: memref<8x32x128xbf16, #tpu.memory_space<vmem>>, %arg8: memref<8x1xi32, #tpu.memory_space<vmem>>, %arg9: memref<32x32xf32, #tpu.memory_space<vmem>>, %arg10: memref<32x10xf32, #tpu.memory_space<vmem>>, %arg11: memref<32x1xf32, #tpu.memory_space<vmem>>, %arg12: memref<1x16xf32, #tpu.memory_space<vmem>>, %arg13: memref<1x32xf32, #tpu.memory_space<vmem>>, %arg14: memref<1x1xf32, #tpu.memory_space<vmem>>, %arg15: memref<8x16xf32, #tpu.memory_space<vmem>>, %arg16: memref<8x128xf32, #tpu.memory_space<vmem>>, %arg17: memref<8x128xf32, #tpu.memory_space<vmem>>, %arg18: memref<8x1xf32, #tpu.memory_space<vmem>>) attributes {dimension_semantics = [#tpu.dimension_semantics<parallel>], iteration_bounds = array<i64: 1>, scalar_prefetch = 0 : i64, scratch_operands = 0 : i64, tpu.core_type = #tpu.core_type<tc>, window_params = [{transform_indices = @transform_0, window_bounds = array<i64: 8, 32>}, {transform_indices = @transform_1, window_bounds = array<i64: 8, 128>}, {transform_indices = @transform_2, window_bounds = array<i64: 8, 128>}, {transform_indices = @transform_3, window_bounds = array<i64: 8, 128>}, {transform_indices = @transform_4, window_bounds = array<i64: 8, 1>}, {transform_indices = @transform_5, window_bounds = array<i64: 8, 128, 16>}, {transform_indices = @transform_6, window_bounds = array<i64: 8, 32, 128>}, {transform_indices = @transform_7, window_bounds = array<i64: 8, 1>}, {pipeline_mode = #tpu.pipeline_mode<synchronous>, transform_indices = @transform_8, window_bounds = array<i64: 32, 32>}, {pipeline_mode = #tpu.pipeline_mode<synchronous>, transform_indices = @transform_9, window_bounds = array<i64: 32, 10>}, {pipeline_mode = #tpu.pipeline_mode<synchronous>, transform_indices = @transform_10, window_bounds = array<i64: 32, 1>}, {pipeline_mode = #tpu.pipeline_mode<synchronous>, transform_indices = @transform_11, window_bounds = array<i64: 1, 16>}, {pipeline_mode = #tpu.pipeline_mode<synchronous>, transform_indices = @transform_12, window_bounds = array<i64: 1, 32>}, {pipeline_mode = #tpu.pipeline_mode<synchronous>, transform_indices = @transform_13, window_bounds = array<i64: 1, 1>}, {transform_indices = @transform_14, window_bounds = array<i64: 8, 16>}, {transform_indices = @transform_15, window_bounds = array<i64: 8, 128>}, {transform_indices = @transform_16, window_bounds = array<i64: 8, 128>}, {transform_indices = @transform_17, window_bounds = array<i64: 8, 1>}]} {
    %c0 = arith.constant 0 : index
    %c0_0 = arith.constant 0 : index
    %0 = vector.load %arg1[%c0, %c0_0] : memref<8x32xf32, #tpu.memory_space<vmem>>, vector<8x32xf32>
    %c0_1 = arith.constant 0 : index
    %c0_2 = arith.constant 0 : index
    %1 = vector.load %arg2[%c0_1, %c0_2] : memref<8x128xf32, #tpu.memory_space<vmem>>, vector<8x128xf32>
    %c0_3 = arith.constant 0 : index
    %c0_4 = arith.constant 0 : index
    %2 = vector.load %arg3[%c0_3, %c0_4] : memref<8x128xf32, #tpu.memory_space<vmem>>, vector<8x128xf32>
    %c0_5 = arith.constant 0 : index
    %c0_6 = arith.constant 0 : index
    %3 = vector.load %arg4[%c0_5, %c0_6] : memref<8x128xf32, #tpu.memory_space<vmem>>, vector<8x128xf32>
    %c0_7 = arith.constant 0 : index
    %c0_8 = arith.constant 0 : index
    %4 = vector.load %arg5[%c0_7, %c0_8] : memref<8x1xf32, #tpu.memory_space<vmem>>, vector<8x1xf32>
    %5 = tpu.iota {dimensions = array<i32: 1>} : vector<8x128xi32>
    %c0_9 = arith.constant 0 : index
    %c0_10 = arith.constant 0 : index
    %6 = vector.load %arg8[%c0_9, %c0_10] : memref<8x1xi32, #tpu.memory_space<vmem>>, vector<8x1xi32>
    %7 = vector.broadcast %6 : vector<8x1xi32> to vector<8x128xi32>
    %8 = arith.cmpi sge, %5, %7 : vector<8x128xi32>
    %c0_11 = arith.constant 0 : index
    %c0_12 = arith.constant 0 : index
    %9 = vector.load %arg9[%c0_11, %c0_12] : memref<32x32xf32, #tpu.memory_space<vmem>>, vector<32x32xf32>
    %cst = arith.constant dense<0.000000e+00> : vector<8x32xf32>
    %10 = tpu.matmul %0, %9, %cst {dimension_numbers = #tpu.dot_dimension_numbers<[1], [0], [0], [1], [0, 0, 1, 1], [], []>} : vector<8x32xf32>, vector<32x32xf32>, vector<8x32xf32> -> vector<8x32xf32>
    %c2_i32 = arith.constant 2 : i32
    %11 = tpu.dynamic_rotate %1 by %c2_i32 dim 1 : vector<8x128xf32>, i32 -> vector<8x128xf32>
    %c2_i32_13 = arith.constant 2 : i32
    %12 = vector.broadcast %c2_i32_13 : i32 to vector<8x128xi32>
    %13 = arith.cmpi sge, %5, %12 : vector<8x128xi32>
    %cst_14 = arith.constant 0.000000e+00 : f32
    %14 = vector.broadcast %cst_14 : f32 to vector<8x128xf32>
    %15 = arith.select %13, %11, %14 : vector<8x128xi1>, vector<8x128xf32>
    %c2_i32_15 = arith.constant 2 : i32
    %16 = tpu.dynamic_rotate %2 by %c2_i32_15 dim 1 : vector<8x128xf32>, i32 -> vector<8x128xf32>
    %c2_i32_16 = arith.constant 2 : i32
    %17 = vector.broadcast %c2_i32_16 : i32 to vector<8x128xi32>
    %18 = arith.cmpi sge, %5, %17 : vector<8x128xi32>
    %cst_17 = arith.constant 0.000000e+00 : f32
    %19 = vector.broadcast %cst_17 : f32 to vector<8x128xf32>
    %20 = arith.select %18, %16, %19 : vector<8x128xi1>, vector<8x128xf32>
    %c1_i32 = arith.constant 1 : i32
    %21 = tpu.dynamic_rotate %1 by %c1_i32 dim 1 : vector<8x128xf32>, i32 -> vector<8x128xf32>
    %c1_i32_18 = arith.constant 1 : i32
    %22 = vector.broadcast %c1_i32_18 : i32 to vector<8x128xi32>
    %23 = arith.cmpi sge, %5, %22 : vector<8x128xi32>
    %cst_19 = arith.constant 0.000000e+00 : f32
    %24 = vector.broadcast %cst_19 : f32 to vector<8x128xf32>
    %25 = arith.select %23, %21, %24 : vector<8x128xi1>, vector<8x128xf32>
    %c1_i32_20 = arith.constant 1 : i32
    %26 = tpu.dynamic_rotate %2 by %c1_i32_20 dim 1 : vector<8x128xf32>, i32 -> vector<8x128xf32>
    %c1_i32_21 = arith.constant 1 : i32
    %27 = vector.broadcast %c1_i32_21 : i32 to vector<8x128xi32>
    %28 = arith.cmpi sge, %5, %27 : vector<8x128xi32>
    %cst_22 = arith.constant 0.000000e+00 : f32
    %29 = vector.broadcast %cst_22 : f32 to vector<8x128xf32>
    %30 = arith.select %28, %26, %29 : vector<8x128xi1>, vector<8x128xf32>
    %c127_i32 = arith.constant 127 : i32
    %31 = tpu.dynamic_rotate %1 by %c127_i32 dim 1 : vector<8x128xf32>, i32 -> vector<8x128xf32>
    %c127_i32_23 = arith.constant 127 : i32
    %32 = vector.broadcast %c127_i32_23 : i32 to vector<8x128xi32>
    %33 = arith.cmpi slt, %5, %32 : vector<8x128xi32>
    %cst_24 = arith.constant 0.000000e+00 : f32
    %34 = vector.broadcast %cst_24 : f32 to vector<8x128xf32>
    %35 = arith.select %33, %31, %34 : vector<8x128xi1>, vector<8x128xf32>
    %c127_i32_25 = arith.constant 127 : i32
    %36 = tpu.dynamic_rotate %2 by %c127_i32_25 dim 1 : vector<8x128xf32>, i32 -> vector<8x128xf32>
    %c127_i32_26 = arith.constant 127 : i32
    %37 = vector.broadcast %c127_i32_26 : i32 to vector<8x128xi32>
    %38 = arith.cmpi slt, %5, %37 : vector<8x128xi32>
    %cst_27 = arith.constant 0.000000e+00 : f32
    %39 = vector.broadcast %cst_27 : f32 to vector<8x128xf32>
    %40 = arith.select %38, %36, %39 : vector<8x128xi1>, vector<8x128xf32>
    %c126_i32 = arith.constant 126 : i32
    %41 = tpu.dynamic_rotate %1 by %c126_i32 dim 1 : vector<8x128xf32>, i32 -> vector<8x128xf32>
    %c126_i32_28 = arith.constant 126 : i32
    %42 = vector.broadcast %c126_i32_28 : i32 to vector<8x128xi32>
    %43 = arith.cmpi slt, %5, %42 : vector<8x128xi32>
    %cst_29 = arith.constant 0.000000e+00 : f32
    %44 = vector.broadcast %cst_29 : f32 to vector<8x128xf32>
    %45 = arith.select %43, %41, %44 : vector<8x128xi1>, vector<8x128xf32>
    %c126_i32_30 = arith.constant 126 : i32
    %46 = tpu.dynamic_rotate %2 by %c126_i32_30 dim 1 : vector<8x128xf32>, i32 -> vector<8x128xf32>
    %c126_i32_31 = arith.constant 126 : i32
    %47 = vector.broadcast %c126_i32_31 : i32 to vector<8x128xi32>
    %48 = arith.cmpi slt, %5, %47 : vector<8x128xi32>
    %cst_32 = arith.constant 0.000000e+00 : f32
    %49 = vector.broadcast %cst_32 : f32 to vector<8x128xf32>
    %50 = arith.select %48, %46, %49 : vector<8x128xi1>, vector<8x128xf32>
    %51 = vector.shape_cast %15 : vector<8x128xf32> to vector<8x1x128xf32>
    %52 = vector.shape_cast %20 : vector<8x128xf32> to vector<8x1x128xf32>
    %53 = vector.shape_cast %25 : vector<8x128xf32> to vector<8x1x128xf32>
    %54 = vector.shape_cast %30 : vector<8x128xf32> to vector<8x1x128xf32>
    %55 = vector.shape_cast %1 : vector<8x128xf32> to vector<8x1x128xf32>
    %56 = vector.shape_cast %2 : vector<8x128xf32> to vector<8x1x128xf32>
    %57 = vector.shape_cast %35 : vector<8x128xf32> to vector<8x1x128xf32>
    %58 = vector.shape_cast %40 : vector<8x128xf32> to vector<8x1x128xf32>
    %59 = vector.shape_cast %45 : vector<8x128xf32> to vector<8x1x128xf32>
    %60 = vector.shape_cast %50 : vector<8x128xf32> to vector<8x1x128xf32>
    %61 = tpu.concatenate %51, %52, %53, %54, %55, %56, %57, %58, %59, %60 in 1 : vector<8x1x128xf32>, vector<8x1x128xf32>, vector<8x1x128xf32>, vector<8x1x128xf32>, vector<8x1x128xf32>, vector<8x1x128xf32>, vector<8x1x128xf32>, vector<8x1x128xf32>, vector<8x1x128xf32>, vector<8x1x128xf32> -> vector<8x10x128xf32>
    %c0_33 = arith.constant 0 : index
    %c0_34 = arith.constant 0 : index
    %62 = vector.load %arg10[%c0_33, %c0_34] : memref<32x10xf32, #tpu.memory_space<vmem>>, vector<32x10xf32>
    %63 = vector.shape_cast %62 : vector<32x10xf32> to vector<1x32x10xf32>
    %64 = vector.shape_cast %63 : vector<1x32x10xf32> to vector<1x32x10xf32>
    %65 = vector.broadcast %64 : vector<1x32x10xf32> to vector<8x32x10xf32>
    "tpu.trace_start"() <{level = 10 : i32, message = "baj,bjt->bat"}> : () -> ()
    %cst_35 = arith.constant dense<0.000000e+00> : vector<8x32x128xf32>
    %66 = tpu.matmul %65, %61, %cst_35 {dimension_numbers = #tpu.dot_dimension_numbers<[2], [1], [1], [2], [0, 0, 0, 1, 1, 2], [0], [0]>} : vector<8x32x10xf32>, vector<8x10x128xf32>, vector<8x32x128xf32> -> vector<8x32x128xf32>
    "tpu.trace_stop"() : () -> ()
    %67 = vector.shape_cast %10 : vector<8x32xf32> to vector<8x32x1xf32>
    %68 = vector.broadcast %67 : vector<8x32x1xf32> to vector<8x32x128xf32>
    %69 = arith.addf %68, %66 : vector<8x32x128xf32>
    %c0_36 = arith.constant 0 : index
    %c0_37 = arith.constant 0 : index
    %c0_38 = arith.constant 0 : index
    %70 = vector.load %arg7[%c0_36, %c0_37, %c0_38] : memref<8x32x128xbf16, #tpu.memory_space<vmem>>, vector<8x32x128xbf16>
    %71 = arith.extf %70 : vector<8x32x128xbf16> to vector<8x32x128xf32>
    %72 = arith.addf %69, %71 : vector<8x32x128xf32>
    %73 = math.tanh %72 : vector<8x32x128xf32>
    %c0_39 = arith.constant 0 : index
    %c0_40 = arith.constant 0 : index
    %74 = vector.load %arg11[%c0_39, %c0_40] : memref<32x1xf32, #tpu.memory_space<vmem>>, vector<32x1xf32>
    %75 = vector.shape_cast %74 : vector<32x1xf32> to vector<1x32x1xf32>
    %76 = vector.broadcast %75 : vector<1x32x1xf32> to vector<8x32x128xf32>
    %77 = arith.mulf %73, %76 : vector<8x32x128xf32>
    %cst_41 = arith.constant dense<0.000000e+00> : vector<8x128xf32>
    %78 = vector.multi_reduction <add>, %77, %cst_41 [1] : vector<8x32x128xf32> to vector<8x128xf32>
    %cst_42 = arith.constant -1.000000e+30 : f32
    %79 = vector.broadcast %cst_42 : f32 to vector<8x128xf32>
    %80 = arith.select %8, %79, %78 : vector<8x128xi1>, vector<8x128xf32>
    %cst_43 = arith.constant dense<0xFF800000> : vector<8xf32>
    %81 = vector.multi_reduction <maximumf>, %80, %cst_43 [1] : vector<8x128xf32> to vector<8xf32>
    %82 = vector.shape_cast %81 : vector<8xf32> to vector<8x1xf32>
    %83 = vector.broadcast %82 : vector<8x1xf32> to vector<8x128xf32>
    %84 = arith.subf %80, %83 : vector<8x128xf32>
    %85 = math.exp %84 : vector<8x128xf32>
    %cst_44 = arith.constant dense<0.000000e+00> : vector<8xf32>
    %86 = vector.multi_reduction <add>, %85, %cst_44 [1] : vector<8x128xf32> to vector<8xf32>
    %87 = vector.shape_cast %86 : vector<8xf32> to vector<8x1xf32>
    %88 = tpu.reciprocal %87 {approx = true} : vector<8x1xf32> -> vector<8x1xf32>
    %89 = vector.broadcast %88 : vector<8x1xf32> to vector<8x128xf32>
    %90 = arith.mulf %85, %89 : vector<8x128xf32>
    %91 = arith.addf %2, %90 : vector<8x128xf32>
    %c0_45 = arith.constant 0 : index
    %c0_46 = arith.constant 0 : index
    %92 = vector.load %arg17[%c0_45, %c0_46] : memref<8x128xf32, #tpu.memory_space<vmem>>, vector<8x128xf32>
    tpu.vector_store %arg17[%c0_45, %c0_46], %91 {strides = array<i32>} : memref<8x128xf32, #tpu.memory_space<vmem>>, vector<8x128xf32>,
    %c0_i32 = arith.constant 0 : i32
    %93 = vector.broadcast %c0_i32 : i32 to vector<8x128xi32>
    %94 = arith.cmpi eq, %5, %93 : vector<8x128xi32>
    %c1_i32_47 = arith.constant 1 : i32
    %95 = tpu.dynamic_rotate %3 by %c1_i32_47 dim 1 : vector<8x128xf32>, i32 -> vector<8x128xf32>
    %cst_48 = arith.constant 0.000000e+00 : f32
    %96 = vector.broadcast %cst_48 : f32 to vector<8x128xf32>
    %97 = arith.select %94, %96, %95 : vector<8x128xi1>, vector<8x128xf32>
    %cst_49 = arith.constant 1.000000e+00 : f32
    %98 = vector.broadcast %cst_49 : f32 to vector<8x1xf32>
    %99 = arith.subf %98, %4 : vector<8x1xf32>
    %100 = vector.broadcast %99 : vector<8x1xf32> to vector<8x128xf32>
    %101 = arith.mulf %100, %3 : vector<8x128xf32>
    %102 = vector.broadcast %4 : vector<8x1xf32> to vector<8x128xf32>
    %103 = arith.mulf %102, %97 : vector<8x128xf32>
    %104 = arith.addf %101, %103 : vector<8x128xf32>
    %cst_50 = arith.constant 9.99999993E-9 : f32
    %105 = vector.broadcast %cst_50 : f32 to vector<8x128xf32>
    %106 = arith.addf %104, %105 : vector<8x128xf32>
    %107 = arith.mulf %106, %90 : vector<8x128xf32>
    %cst_51 = arith.constant dense<0.000000e+00> : vector<8xf32>
    %108 = vector.multi_reduction <add>, %107, %cst_51 [1] : vector<8x128xf32> to vector<8xf32>
    %109 = vector.shape_cast %108 : vector<8xf32> to vector<8x1xf32>
    %110 = tpu.reciprocal %109 {approx = true} : vector<8x1xf32> -> vector<8x1xf32>
    %111 = vector.broadcast %110 : vector<8x1xf32> to vector<8x128xf32>
    %112 = arith.mulf %107, %111 : vector<8x128xf32>
    %c0_52 = arith.constant 0 : index
    %c0_53 = arith.constant 0 : index
    %113 = vector.load %arg16[%c0_52, %c0_53] : memref<8x128xf32, #tpu.memory_space<vmem>>, vector<8x128xf32>
    tpu.vector_store %arg16[%c0_52, %c0_53], %112 {strides = array<i32>} : memref<8x128xf32, #tpu.memory_space<vmem>>, vector<8x128xf32>,
    %114 = vector.shape_cast %112 : vector<8x128xf32> to vector<8x1x128xf32>
    %115 = arith.truncf %114 : vector<8x1x128xf32> to vector<8x1x128xbf16>
    %c0_54 = arith.constant 0 : index
    %c0_55 = arith.constant 0 : index
    %c0_56 = arith.constant 0 : index
    %116 = vector.load %arg6[%c0_54, %c0_55, %c0_56] : memref<8x128x16xbf16, #tpu.memory_space<vmem>>, vector<8x128x16xbf16>
    "tpu.trace_start"() <{level = 10 : i32, message = "bqt,bte->bqe"}> : () -> ()
    %cst_57 = arith.constant dense<0.000000e+00> : vector<8x1x16xf32>
    %117 = tpu.matmul %115, %116, %cst_57 {dimension_numbers = #tpu.dot_dimension_numbers<[2], [1], [1], [2], [0, 0, 0, 1, 1, 2], [0], [0]>} : vector<8x1x128xbf16>, vector<8x128x16xbf16>, vector<8x1x16xf32> -> vector<8x1x16xf32>
    "tpu.trace_stop"() : () -> ()
    %118 = vector.shape_cast %117 : vector<8x1x16xf32> to vector<8x16xf32>
    %c0_58 = arith.constant 0 : index
    %c0_59 = arith.constant 0 : index
    %119 = vector.load %arg15[%c0_58, %c0_59] : memref<8x16xf32, #tpu.memory_space<vmem>>, vector<8x16xf32>
    tpu.vector_store %arg15[%c0_58, %c0_59], %118 {strides = array<i32>} : memref<8x16xf32, #tpu.memory_space<vmem>>, vector<8x16xf32>,
    %c0_60 = arith.constant 0 : index
    %c0_61 = arith.constant 0 : index
    %120 = vector.load %arg12[%c0_60, %c0_61] : memref<1x16xf32, #tpu.memory_space<vmem>>, vector<1x16xf32>
    %121 = vector.broadcast %120 : vector<1x16xf32> to vector<8x16xf32>
    %122 = arith.mulf %118, %121 : vector<8x16xf32>
    %cst_62 = arith.constant dense<0.000000e+00> : vector<8xf32>
    %123 = vector.multi_reduction <add>, %122, %cst_62 [1] : vector<8x16xf32> to vector<8xf32>
    %124 = vector.shape_cast %123 : vector<8xf32> to vector<8x1xf32>
    %c0_63 = arith.constant 0 : index
    %c0_64 = arith.constant 0 : index
    %125 = vector.load %arg13[%c0_63, %c0_64] : memref<1x32xf32, #tpu.memory_space<vmem>>, vector<1x32xf32>
    %126 = vector.broadcast %125 : vector<1x32xf32> to vector<8x32xf32>
    %127 = arith.mulf %0, %126 : vector<8x32xf32>
    %cst_65 = arith.constant dense<0.000000e+00> : vector<8xf32>
    %128 = vector.multi_reduction <add>, %127, %cst_65 [1] : vector<8x32xf32> to vector<8xf32>
    %129 = vector.shape_cast %128 : vector<8xf32> to vector<8x1xf32>
    %130 = arith.addf %124, %129 : vector<8x1xf32>
    %c0_66 = arith.constant 0 : index
    %c0_67 = arith.constant 0 : index
    %131 = vector.load %arg14[%c0_66, %c0_67] : memref<1x1xf32, #tpu.memory_space<vmem>>, vector<1x1xf32>
    %132 = vector.broadcast %131 : vector<1x1xf32> to vector<8x1xf32>
    %133 = arith.addf %130, %132 : vector<8x1xf32>
    %cst_68 = arith.constant 0.000000e+00 : f32
    %134 = vector.broadcast %cst_68 : f32 to vector<8x1xf32>
    %135 = arith.addf %133, %134 : vector<8x1xf32>
    %136 = arith.negf %135 : vector<8x1xf32>
    %137 = math.exp %136 : vector<8x1xf32>
    %cst_69 = arith.constant 1.000000e+00 : f32
    %138 = vector.broadcast %cst_69 : f32 to vector<8x1xf32>
    %139 = arith.addf %138, %137 : vector<8x1xf32>
    %140 = arith.divf %138, %139 : vector<8x1xf32>
    %c0_70 = arith.constant 0 : index
    %c0_71 = arith.constant 0 : index
    %141 = vector.load %arg18[%c0_70, %c0_71] : memref<8x1xf32, #tpu.memory_space<vmem>>, vector<8x1xf32>
    tpu.vector_store %arg18[%c0_70, %c0_71], %140 {strides = array<i32>} : memref<8x1xf32, #tpu.memory_space<vmem>>, vector<8x1xf32>,
    return
  }
  func.func @transform_0(%arg0: i32) -> (i32, i32) {
    %c0_i32 = arith.constant 0 : i32
    %c0_i32_0 = arith.constant 0 : i32
    return %arg0, %c0_i32 : i32, i32
  }
  func.func @transform_1(%arg0: i32) -> (i32, i32) {
    %c0_i32 = arith.constant 0 : i32
    %c0_i32_0 = arith.constant 0 : i32
    return %arg0, %c0_i32 : i32, i32
  }
  func.func @transform_2(%arg0: i32) -> (i32, i32) {
    %c0_i32 = arith.constant 0 : i32
    %c0_i32_0 = arith.constant 0 : i32
    return %arg0, %c0_i32 : i32, i32
  }
  func.func @transform_3(%arg0: i32) -> (i32, i32) {
    %c0_i32 = arith.constant 0 : i32
    %c0_i32_0 = arith.constant 0 : i32
    return %arg0, %c0_i32 : i32, i32
  }
  func.func @transform_4(%arg0: i32) -> (i32, i32) {
    %c0_i32 = arith.constant 0 : i32
    %c0_i32_0 = arith.constant 0 : i32
    return %arg0, %c0_i32 : i32, i32
  }
  func.func @transform_5(%arg0: i32) -> (i32, i32, i32) {
    %c0_i32 = arith.constant 0 : i32
    %c0_i32_0 = arith.constant 0 : i32
    %c0_i32_1 = arith.constant 0 : i32
    return %arg0, %c0_i32, %c0_i32_0 : i32, i32, i32
  }
  func.func @transform_6(%arg0: i32) -> (i32, i32, i32) {
    %c0_i32 = arith.constant 0 : i32
    %c0_i32_0 = arith.constant 0 : i32
    %c0_i32_1 = arith.constant 0 : i32
    return %arg0, %c0_i32, %c0_i32_0 : i32, i32, i32
  }
  func.func @transform_7(%arg0: i32) -> (i32, i32) {
    %c0_i32 = arith.constant 0 : i32
    %c0_i32_0 = arith.constant 0 : i32
    return %arg0, %c0_i32 : i32, i32
  }
  func.func @transform_8(%arg0: i32) -> (i32, i32) {
    %c0_i32 = arith.constant 0 : i32
    %c0_i32_0 = arith.constant 0 : i32
    %c0_i32_1 = arith.constant 0 : i32
    return %c0_i32, %c0_i32_0 : i32, i32
  }
  func.func @transform_9(%arg0: i32) -> (i32, i32) {
    %c0_i32 = arith.constant 0 : i32
    %c0_i32_0 = arith.constant 0 : i32
    %c0_i32_1 = arith.constant 0 : i32
    return %c0_i32, %c0_i32_0 : i32, i32
  }
  func.func @transform_10(%arg0: i32) -> (i32, i32) {
    %c0_i32 = arith.constant 0 : i32
    %c0_i32_0 = arith.constant 0 : i32
    %c0_i32_1 = arith.constant 0 : i32
    return %c0_i32, %c0_i32_0 : i32, i32
  }
  func.func @transform_11(%arg0: i32) -> (i32, i32) {
    %c0_i32 = arith.constant 0 : i32
    %c0_i32_0 = arith.constant 0 : i32
    %c0_i32_1 = arith.constant 0 : i32
    return %c0_i32, %c0_i32_0 : i32, i32
  }
  func.func @transform_12(%arg0: i32) -> (i32, i32) {
    %c0_i32 = arith.constant 0 : i32
    %c0_i32_0 = arith.constant 0 : i32
    %c0_i32_1 = arith.constant 0 : i32
    return %c0_i32, %c0_i32_0 : i32, i32
  }
  func.func @transform_13(%arg0: i32) -> (i32, i32) {
    %c0_i32 = arith.constant 0 : i32
    %c0_i32_0 = arith.constant 0 : i32
    %c0_i32_1 = arith.constant 0 : i32
    return %c0_i32, %c0_i32_0 : i32, i32
  }
  func.func @transform_14(%arg0: i32) -> (i32, i32) {
    %c0_i32 = arith.constant 0 : i32
    %c0_i32_0 = arith.constant 0 : i32
    return %arg0, %c0_i32 : i32, i32
  }
  func.func @transform_15(%arg0: i32) -> (i32, i32) {
    %c0_i32 = arith.constant 0 : i32
    %c0_i32_0 = arith.constant 0 : i32
    return %arg0, %c0_i32 : i32, i32
  }
  func.func @transform_16(%arg0: i32) -> (i32, i32) {
    %c0_i32 = arith.constant 0 : i32
    %c0_i32_0 = arith.constant 0 : i32
    return %arg0, %c0_i32 : i32, i32
  }
  func.func @transform_17(%arg0: i32) -> (i32, i32) {
    %c0_i32 = arith.constant 0 : i32
    %c0_i32_0 = arith.constant 0 : i32
    return %arg0, %c0_i32 : i32, i32
  }
}

</mosaic_0001>

<bundles_post_ra>
// kernel: tpu_custom_call.1
= control target key start
LH: loop header
LB: loop body
LE: loop exit
PB: predicated region body
PF: predicated region fallthrough
CT: control target
= control target key end

     0   :  { %s3708_s0 = inlined_call_operand.vmem [shape: f32[8,32], index: 0, kind: input, shape index: {}]   ;;  %s3709_s1 = inlined_call_operand.vmem [shape: f32[8,128], index: 1, kind: input, shape index: {}]   ;;  %s3710_s2 = inlined_call_operand.vmem [shape: f32[8,128], index: 2, kind: input, shape index: {}]   ;;  %s3711_s3 = inlined_call_operand.vmem [shape: f32[8,128], index: 3, kind: input, shape index: {}]   ;;  %s3712_s4 = inlined_call_operand.vmem [shape: f32[8,1], index: 4, kind: input, shape index: {}]   ;;  %s3713_s5 = inlined_call_operand.vmem [shape: bf16[8,128,16], index: 5, kind: input, shape index: {}]   ;;  %s3714_s6 = inlined_call_operand.vmem [shape: bf16[8,32,128], index: 6, kind: input, shape index: {}]   ;;  %s3715_s7 = inlined_call_operand.vmem [shape: s32[8,1], index: 7, kind: input, shape index: {}]   ;;  %s3716_s8 = inlined_call_operand.vmem [shape: f32[32,32], index: 8, kind: input, shape index: {}]   ;;  %s3717_s9 = inlined_call_operand.vmem [shape: f32[32,10], index: 9, kind: input, shape index: {}]   ;;  %s3718_s10 = inlined_call_operand.vmem [shape: f32[32,1], index: 10, kind: input, shape index: {}]   ;;  %s3719_s11 = inlined_call_operand.vmem [shape: f32[1,16], index: 11, kind: input, shape index: {}]   ;;  %s3720_s12 = inlined_call_operand.vmem [shape: f32[1,32], index: 12, kind: input, shape index: {}]   ;;  %s3721_s13 = inlined_call_operand.<no memory space> [shape: f32[1,1], index: 13, kind: input, shape index: {}]   ;;  %s3722_s14 = inlined_call_operand.hbm [shape: f32[8,16], index: 14, kind: output, shape index: {0}]   ;;  %s3723_s15 = inlined_call_operand.hbm [shape: f32[8,128], index: 15, kind: output, shape index: {1}]   ;;  %s3724_s16 = inlined_call_operand.hbm [shape: f32[8,128], index: 16, kind: output, shape index: {2}]   ;;  %s3725_s17 = inlined_call_operand.vmem [shape: f32[8,1], index: 17, kind: output, shape index: {3}]  }
   0x1   :  { %3727 = sst [smem:[#allocation10_spill]] %s3708_s0  ;;  %v23_v0 = vstv %s3721_s13 }
   0x2   :  { %3728 = sst [smem:[#allocation11_spill]] %s3709_s1  ;;  %24 = vst [vmem:[#allocation2] sm:$0x1] %v23_v0 }
   0x3   :  { %25 = vsyncpa [#allocation4], 0  ;;  %v70_v1 = vld [vmem:[%s3716_s8 + $0x18] sm:$0xff]  ;;  %v69_v2 = vld [vmem:[%s3716_s8 + $0x10] sm:$0xff]  ;;  %s3729_s18 = sld [smem:[#allocation11_spill]]  ;;  %v60_v4 = vlaneseq  ;;  %s2677_s13 = smov 126  }
   0x4   :  { %87 = vmatpush.msra.mxu0 %v70_v1  ;;  %v2792_v5 = vld [vmem:[%s3710_s2] sm:$0xff]  ;;  %v68_v7 = vld [vmem:[%s3716_s8 + $0x8] sm:$0xff] }
   0x5   :  { %120 = vrot.lane.b32.xlu1 %v2792_v5, %s2677_s13  ;;  %v2801_v8 = vshrl.u32 %v60_v4, 7 }
   0x6   :  { %88 = vmatpush.msra.mxu0 %v69_v2 }
   0x9   :  { %v2787_v3 = vld [vmem:[%s3729_s18] sm:$0xff] }
   0xa   :  { %116 = vrot.lane.b32.xlu2 %v2787_v3, %s2677_s13  ;;  %v2477_v6 = vpack.i.bf16 %v2787_v3, %v2792_v5 }
   0xb   :  { %26 = vsyncpa [#allocation6], 0  ;;  %s2678_s22 = smov 2   ;;  %v67_v9 = vld [vmem:[%s3716_s8] sm:$0xff]  ;;  %89 = vmatpush.msra.mxu0 %v68_v7  ;;  %s3730_s27 = sld [smem:[#allocation10_spill]]  ;;  %vm71_vm0 = vcmask 261120   ;;  %2493 = vset.pattern.permute.xlu2 %v2801_v8  ;;  %v2487_v11 = vpack.i.bf16 %v2792_v5, %v2787_v3 }
   0xc   :  { %2478 = vrot.lane.b32.xlu0 %v2477_v6, %s2678_s22  ;;  %s2679_s28 = smov 127   ;;  %s2680_s29 = smov 1   ;;  %v2681_v12 = vmov 0   ;;  %v1049_v13 = vld [vmem:[%s3718_s10] sm:$0xff]  ;;  %v2819_v14 = vadd.s32 8, %v2801_v8  ;;  %v2823_v15 = vand.u32 127, %v60_v4 }
   0xd   :  { %90 = vmatpush.msra.mxu0 %v67_v9  ;;  %2488 = vrot.lane.b32.xlu1 %v2487_v11, %s2679_s28  ;;  %vm345_vm3 = vcmask 1040384   ;;  %vm354_vm4 = vcmask 1041408   ;;  %v265_v18 = vperm.slane %v2787_v3, 0  ;;  %v163_v20 = vrot.slane %v2787_v3, 1  ;;  %s2683_s25 = smov [#allocation3]   ;;  %s2004_s0 = sshll.u32 %s3724_s16, 4  ;;  %s2005_s0 = int_to_ptr.hbm [resolvable:$true] %s2004_s0 }
   0xe   :  { %2492 = vset.pattern.permute.xlu1 %v2681_v12  ;;  %2494 = vset.pattern.permute.xlu0 %v2819_v14  ;;  %vm118_vm1 = vcmp.lt.s32.totalorder %v2823_v15, 126  ;;  %vm97_vm2 = vcmp.ge.s32.totalorder %v2823_v15, 2  ;;  %vm111_vm5 = vcmp.lt.s32.totalorder %v2823_v15, 127  ;;  %v171_v21 = vrot.slane %v2792_v5, 1  ;;  %s1980_s26 = sshll.u32 %s2683_s25, 4  ;;  %s2684_s30 = smov [#allocation7]   ;;  %s1981_s26 = int_to_ptr.vmem [resolvable:$true] %s1980_s26 }
   0xf   :  { %v164_v22 = vrot.slane %v2787_v3, 2  ;;  %v172_v23 = vrot.slane %v2792_v5, 2  ;;  %vm104_vm6 = vcmp.ge.s32.totalorder %v2823_v15, 1  ;;  %v165_v35 = vrot.slane %v2787_v3, 3 }
  0x10   :  { %v173_v36 = vrot.slane %v2792_v5, 3  ;;  %v281_v43 = vperm.slane %v2792_v5, 0  ;;  %v2859_v44 = vperm.slane %v163_v20, 0  ;;  %vm363_vm7 = vcmask 1042432  }
  0x11   :  { %v55_v10 = vld [vmem:[%s3730_s27] sm:$0xff]  ;;  %v2863_v47 = vperm.slane %v171_v21, 0  ;;  %v2865_v48 = vperm.slane %v164_v22, 0  ;;  %vm372_vm8 = vcmask 1043456   ;;  %v2873_v52 = vperm.slane %v172_v23, 0 }
  0x12   :  { %2026 = vmatmul.msk.f32.vlgmr.msra.gmra.mxu0 %vm71_vm0, %v55_v10  ;;  %vm381_vm9 = vcmask 1044480   ;;  %v2880_v56 = vperm.slane %v165_v35, 0  ;;  %v2882_v57 = vperm.slane %v173_v36, 0  ;;  %vm390_vm10 = vcmask 1045504  }
  0x13   :  { %vm399_vm11 = vcmask 1046528   ;;  %vm420_vm12 = vcmask 80896   ;;  %vm1185_vm13 = vcmask 1041409   ;;  %vm1187_vm14 = vcmask 1042434  }
  0x14   :  { %2483 = vrot.lane.b32.xlu0 %v2487_v11, %s2680_s29  ;;  %vm1189_vm15 = vcmask 1043459  }
  0x15   :  { %1055 = vperm.xlu1 %2492, %v1049_v13  }
  0x1d   :  { %2495 = vset.pattern.permute.xlu1 %v2801_v8 }
  0x64   :  { %v117_v16 = vpop.permute.xlu2 %116 }
  0x65   :  { %v2826_v17 = vsel %vm118_vm1, %v117_v16, 0.0 }
  0x66   :  { %v195_v25 = vrot.slane %v2826_v17, 1  ;;  %v196_v26 = vrot.slane %v2826_v17, 2  ;;  %v197_v27 = vrot.slane %v2826_v17, 3 }
  0x77   :  { %v121_v19 = vpop.permute.xlu1 %120 }
  0x78   :  { %v2835_v24 = vsel %vm118_vm1, %v121_v19, 0.0  ;;  %vm1191_vm1 = vcmask 1044484  }
  0x79   :  { %v329_v29 = vperm.slane %v2835_v24, 0  ;;  %v210_v30 = vrot.slane %v2835_v24, 1  ;;  %v211_v31 = vrot.slane %v2835_v24, 2  ;;  %v212_v32 = vrot.slane %v2835_v24, 3 }
  0x7b   :  { %v408_v37 = vsel %vm345_vm3, %v2826_v17, %v329_v29  ;;  %v330_v38 = vperm.slane %v210_v30, 0  ;;  %v331_v39 = vperm.slane %v211_v31, 0  ;;  %v332_v40 = vperm.slane %v212_v32, 0 }
  0x7c   :  { %2027 = vmatpush.msk.msra.mxu1 %vm354_vm4, %v408_v37 }
  0x7d   :  { %v409_v46 = vsel %vm345_vm3, %v195_v25, %v330_v38  ;;  %v410_v49 = vsel %vm345_vm3, %v196_v26, %v331_v39  ;;  %v2870_v50 = vsel %vm345_vm3, %v197_v27, %v332_v40 }
  0x7e   :  { %v2479_v28 = vpop.permute.xlu0 %2478  ;;  %2032 = vmatpush.msk.msra.mxu2 %vm354_vm4, %v409_v46  ;;  %2037 = vmatpush.msk.msra.mxu3 %vm354_vm4, %v410_v49 }
  0x7f   :  { %v2481_v33 = vunpack.i.h.bf16 %v2479_v28  ;;  %v2480_v34 = vunpack.i.l.bf16 %v2479_v28  ;;  %v2489_v53 = vpop.permute.xlu1 %2488  ;;  %2042 = vmatpush.msk.msrb.mxu0 %vm354_vm4, %v2870_v50 }
  0x80   :  { %v2491_v58 = vunpack.i.h.bf16 %v2489_v53  ;;  %v2490_v59 = vunpack.i.l.bf16 %v2489_v53 }
  0x81   :  { %v2851_v41 = vsel %vm97_vm2, %v2481_v33, 0.0  ;;  %v2855_v42 = vsel %vm97_vm2, %v2480_v34, 0.0  ;;  %vm1193_vm2 = vcmask 1045509  }
  0x82   :  { %v217_v45 = vperm.slane %v2855_v42, 0  ;;  %v139_v51 = vrot.slane %v2855_v42, 1  ;;  %v124_v54 = vrot.slane %v2851_v41, 1  ;;  %v140_v55 = vrot.slane %v2855_v42, 2 }
  0x83   :  { %v125_v63 = vrot.slane %v2851_v41, 2  ;;  %v126_v1 = vrot.slane %v2851_v41, 3  ;;  %v141_v2 = vrot.slane %v2855_v42, 3  ;;  %v2891_v7 = vsel %vm111_vm5, %v2491_v58, 0.0 }
  0x84   :  { %v346_v60 = vsel %vm345_vm3, %v2851_v41, %v217_v45  ;;  %v218_v61 = vperm.slane %v139_v51, 0  ;;  %v219_v0 = vperm.slane %v140_v55, 0  ;;  %v2895_v9 = vsel %vm111_vm5, %v2490_v59, 0.0 }
  0x85   :  { %v297_v10 = vperm.slane %v2895_v9, 0  ;;  %v313_v11 = vperm.slane %v2891_v7, 0  ;;  %v179_v13 = vrot.slane %v2895_v9, 1  ;;  %v187_v16 = vrot.slane %v2891_v7, 1 }
  0x86   :  { %v2484_v62 = vpop.permute.xlu0 %2483  ;;  %v347_v21 = vsel %vm345_vm3, %v124_v54, %v218_v61  ;;  %v180_v22 = vrot.slane %v2895_v9, 2  ;;  %v188_v35 = vrot.slane %v2891_v7, 2  ;;  %v348_v58 = vsel %vm345_vm3, %v125_v63, %v219_v0 }
  0x87   :  { %v2486_v4 = vunpack.i.h.bf16 %v2484_v62  ;;  %v2485_v6 = vunpack.i.l.bf16 %v2484_v62  ;;  %v298_v28 = vperm.slane %v179_v13, 0  ;;  %v314_v29 = vperm.slane %v187_v16, 0 }
  0x88   :  { %v299_v40 = vperm.slane %v180_v22, 0  ;;  %v315_v55 = vperm.slane %v188_v35, 0  ;;  %v189_v13 = vrot.slane %v2891_v7, 3  ;;  %v220_v16 = vperm.slane %v141_v2, 0  ;;  %v2997_v35 = vld [vmem:[%s3717_s9 + $0x8] sm:$0xff] }
  0x89   :  { %v2903_v19 = vsel %vm104_vm6, %v2486_v4, 0.0  ;;  %v2907_v20 = vsel %vm104_vm6, %v2485_v6, 0.0  ;;  %vm1212_vm6 = vcmp.eq.s32.totalorder %v2823_v15, 0 }
  0x8a   :  { %v233_v23 = vperm.slane %v2907_v20, 0  ;;  %v249_v25 = vperm.slane %v2903_v19, 0  ;;  %v147_v26 = vrot.slane %v2907_v20, 1  ;;  %v155_v27 = vrot.slane %v2903_v19, 1 }
  0x8b   :  { %v148_v30 = vrot.slane %v2907_v20, 2  ;;  %v156_v31 = vrot.slane %v2903_v19, 2  ;;  %v149_v61 = vrot.slane %v2907_v20, 3  ;;  %v157_v4 = vrot.slane %v2903_v19, 3 }
  0x8c   :  { %v355_v32 = vsel %vm354_vm4, %v346_v60, %v233_v23  ;;  %v234_v33 = vperm.slane %v147_v26, 0  ;;  %v250_v34 = vperm.slane %v155_v27, 0  ;;  %v316_v27 = vperm.slane %v189_v13, 0 }
  0x8d   :  { %v364_v37 = vsel %vm363_vm7, %v355_v32, %v249_v25  ;;  %v235_v38 = vperm.slane %v148_v30, 0  ;;  %v251_v39 = vperm.slane %v156_v31, 0  ;;  %v252_v23 = vperm.slane %v157_v4, 0 }
  0x8e   :  { %v373_v49 = vsel %vm372_vm8, %v364_v37, %v265_v18  ;;  %v356_v51 = vsel %vm354_vm4, %v347_v21, %v234_v33  ;;  %v2943_v18 = vld [vmem:[%s3717_s9] sm:$0xff]  ;;  %v236_v21 = vperm.slane %v149_v61, 0  ;;  %v128_v30 = vrot.slane %v2851_v41, 5 }
  0x8f   :  { %v2919_v36 = vpop.f32.mrf.mxu0  ;;  %v382_v53 = vsel %vm381_vm9, %v373_v49, %v281_v43  ;;  %v365_v54 = vsel %vm363_vm7, %v356_v51, %v250_v34  ;;  %v357_v43 = vsel %vm354_vm4, %v348_v58, %v235_v38  ;;  %v143_v32 = vrot.slane %v2855_v42, 5 }
  0x90   :  { %v2923_v45 = vperm.slane %v2919_v36, 1  ;;  %v2926_v46 = vperm.slane %v2919_v36, 0  ;;  %v391_v59 = vsel %vm390_vm10, %v382_v53, %v297_v10  ;;  %v374_v60 = vsel %vm372_vm8, %v365_v54, %v2859_v44 }
  0x91   :  { %v400_v62 = vsel %vm399_vm11, %v391_v59, %v313_v11  ;;  %v383_v63 = vsel %vm381_vm9, %v374_v60, %v2863_v47  ;;  %v366_v0 = vsel %vm363_vm7, %v357_v43, %v251_v39  ;;  %v181_v10 = vrot.slane %v2895_v9, 3 }
  0x92   :  { %719 = vperm.xlu1 %2495, %v2923_v45   ;;  %700 = vperm.xlu0 %2494, %v2926_v46   ;;  %v392_v6 = vsel %vm390_vm10, %v383_v63, %v298_v28  ;;  %v375_v44 = vsel %vm372_vm8, %v366_v0, %v2865_v48  ;;  %v2967_v48 = vadd.s32 16, %v2801_v8  ;;  %v2978_v2 = vperm.slane %v2919_v36, 2 }
  0x93   :  { %694 = vperm.xlu2 %2493, %v2926_v46   ;;  %451 = vmatpush.msra.mxu1 %v400_v62  ;;  %v401_v11 = vsel %vm399_vm11, %v392_v6, %v314_v29  ;;  %v384_v47 = vsel %vm381_vm9, %v375_v44, %v2873_v52  ;;  %v300_v25 = vperm.slane %v181_v10, 0  ;;  %v349_v52 = vsel %vm345_vm3, %v126_v1, %v220_v16 }
  0x94   :  { %2028 = vmatmul.msk.f32.vlgmr.msra.gmra.mxu1 %vm420_vm12, %v2943_v18  ;;  %483 = vmatpush.msra.mxu2 %v401_v11  ;;  %v393_v22 = vsel %vm390_vm10, %v384_v47, %v299_v40  ;;  %v358_v28 = vsel %vm354_vm4, %v349_v52, %v236_v21  ;;  %v199_v29 = vrot.slane %v2826_v17, 5  ;;  %v151_v1 = vrot.slane %v2907_v20, 5 }
  0x95   :  { %2467 = vmatpush.msk.msrb.mxu1 %vm354_vm4, %v2870_v50  ;;  %v402_v26 = vsel %vm399_vm11, %v393_v22, %v315_v55  ;;  %2033 = vmatmul.msk.f32.vlgmr.msra.gmra.mxu2 %vm420_vm12, %v2943_v18  ;;  %v214_v50 = vrot.slane %v2835_v24, 5  ;;  %v367_v31 = vsel %vm363_vm7, %v358_v28, %v252_v23  ;;  %v159_v33 = vrot.slane %v2903_v19, 5  ;;  %v3035_v23 = vld [vmem:[%s3717_s9 + $0x10] sm:$0xff] }
  0x96   :  { %515 = vmatpush.msra.mxu3 %v402_v26  ;;  %v376_v34 = vsel %vm372_vm8, %v367_v31, %v2880_v56  ;;  %v167_v38 = vrot.slane %v2787_v3, 5  ;;  %v175_v39 = vrot.slane %v2792_v5, 5  ;;  %v183_v56 = vrot.slane %v2895_v9, 5 }
  0x97   :  { %2038 = vmatmul.msk.f32.vlgmr.msra.gmra.mxu3 %vm420_vm12, %v2943_v18  ;;  %v334_v37 = vperm.slane %v214_v50, 0  ;;  %v385_v40 = vsel %vm381_vm9, %v376_v34, %v2882_v57  ;;  %v191_v49 = vrot.slane %v2891_v7, 5  ;;  %v222_v51 = vperm.slane %v143_v32, 0 }
  0x98   :  { %v394_v53 = vsel %vm390_vm10, %v385_v40, %v300_v25  ;;  %v238_v55 = vperm.slane %v151_v1, 0  ;;  %v254_v58 = vperm.slane %v159_v33, 0  ;;  %v142_v59 = vrot.slane %v2855_v42, 4 }
  0x99   :  { %v413_v54 = vsel %vm345_vm3, %v199_v29, %v334_v37  ;;  %v403_v60 = vsel %vm399_vm11, %v394_v53, %v316_v27  ;;  %v270_v57 = vperm.slane %v167_v38, 0  ;;  %v286_v43 = vperm.slane %v175_v39, 0 }
  0x9a   :  { %744 = vperm.xlu1 %2495, %v2978_v2   ;;  %2497 = vset.pattern.permute.xlu0 %v2967_v48  ;;  %v351_v61 = vsel %vm345_vm3, %v128_v30, %v222_v51  ;;  %v198_v62 = vrot.slane %v2826_v17, 4  ;;  %v213_v63 = vrot.slane %v2835_v24, 4  ;;  %v302_v0 = vperm.slane %v183_v56, 0 }
  0x9b   :  { %2496 = vset.pattern.permute.xlu2 %v2819_v14  ;;  %2052 = vmatpush.msk.msrb.mxu2 %vm354_vm4, %v413_v54  ;;  %v318_v4 = vperm.slane %v191_v49, 0  ;;  %v360_v6 = vsel %vm354_vm4, %v351_v61, %v238_v55  ;;  %v150_v13 = vrot.slane %v2907_v20, 4  ;;  %v158_v11 = vrot.slane %v2903_v19, 4  ;;  %v3063_v49 = vld [vmem:[%s3717_s9 + $0x18] sm:$0xff] }
  0x9c   :  { %2029 = vmatmul.msk.f32.gmra.mxu1 %vm420_vm12, %v2997_v35  ;;  %547 = vmatpush.msrb.mxu0 %v403_v60  ;;  %v369_v44 = vsel %vm363_vm7, %v360_v6, %v254_v58  ;;  %v333_v10 = vperm.slane %v213_v63, 0  ;;  %v127_v16 = vrot.slane %v2851_v41, 4  ;;  %v166_v21 = vrot.slane %v2787_v3, 4 }
  0x9d   :  { %2468 = vmatpush.msrb.mxu1 %v403_v60  ;;  %2043 = vmatmul.msk.f32.vlgmr.msrb.gmra.mxu0 %vm420_vm12, %v2943_v18  ;;  %v378_v47 = vsel %vm372_vm8, %v369_v44, %v270_v57  ;;  %v174_v22 = vrot.slane %v2792_v5, 4  ;;  %v182_v27 = vrot.slane %v2895_v9, 4  ;;  %v221_v52 = vperm.slane %v142_v59, 0 }
  0x9e   :  { %2034 = vmatmul.msk.f32.gmra.mxu2 %vm420_vm12, %v2997_v35  ;;  %v387_v25 = vsel %vm381_vm9, %v378_v47, %v286_v43  ;;  %v412_v26 = vsel %vm345_vm3, %v198_v62, %v333_v10  ;;  %v190_v29 = vrot.slane %v2891_v7, 4  ;;  %v237_v50 = vperm.slane %v150_v13, 0 }
  0x9f   :  { %2039 = vmatmul.msk.f32.gmra.mxu3 %vm420_vm12, %v2997_v35  ;;  %v396_v28 = vsel %vm390_vm10, %v387_v25, %v302_v0  ;;  %2047 = vmatpush.msk.msra.mxu1 %vm354_vm4, %v412_v26  ;;  %v253_v30 = vperm.slane %v158_v11, 0  ;;  %v269_v32 = vperm.slane %v166_v21, 0  ;;  %v285_v1 = vperm.slane %v174_v22, 0 }
  0xa0   :  { %v405_v31 = vsel %vm399_vm11, %v396_v28, %v318_v4  ;;  %v350_v33 = vsel %vm345_vm3, %v127_v16, %v221_v52  ;;  %v301_v34 = vperm.slane %v182_v27, 0  ;;  %v317_v38 = vperm.slane %v190_v29, 0 }
  0xa1   :  { %611 = vmatpush.msrb.mxu2 %v405_v31  ;;  %v359_v37 = vsel %vm354_vm4, %v350_v33, %v237_v50  ;;  %v145_v53 = vrot.slane %v2855_v42, 7  ;;  %v201_v55 = vrot.slane %v2826_v17, 7  ;;  %v216_v58 = vrot.slane %v2835_v24, 7 }
  0xa2   :  { %2498 = vset.pattern.permute.xlu1 %v2967_v48  ;;  %706 = vperm.xlu0 %2497, %v2926_v46   ;;  %v368_v39 = vsel %vm363_vm7, %v359_v37, %v253_v30  ;;  %v130_v59 = vrot.slane %v2851_v41, 7  ;;  %v153_v60 = vrot.slane %v2907_v20, 7  ;;  %v161_v57 = vrot.slane %v2903_v19, 7 }
  0xa3   :  { %725 = vperm.xlu2 %2496, %v2923_v45   ;;  %v377_v40 = vsel %vm372_vm8, %v368_v39, %v269_v32  ;;  %v169_v43 = vrot.slane %v2787_v3, 7  ;;  %v177_v61 = vrot.slane %v2792_v5, 7  ;;  %v185_v62 = vrot.slane %v2895_v9, 7 }
  0xa4   :  { %2030 = vmatmul.msk.f32.gmra.mxu1 %vm420_vm12, %v3035_v23  ;;  %v386_v56 = vsel %vm381_vm9, %v377_v40, %v285_v1  ;;  %v336_v63 = vperm.slane %v216_v58, 0  ;;  %v193_v0 = vrot.slane %v2891_v7, 7  ;;  %v224_v4 = vperm.slane %v145_v53, 0 }
  0xa5   :  { %2044 = vmatmul.msk.f32.gmra.mxu0 %vm420_vm12, %v2997_v35  ;;  %v395_v51 = vsel %vm390_vm10, %v386_v56, %v301_v34  ;;  %v240_v6 = vperm.slane %v153_v60, 0  ;;  %v3085_v44 = vperm.slane %v2919_v36, 4  ;;  %v256_v10 = vperm.slane %v161_v57, 0  ;;  %v1050_v57 = vld [vmem:[%s3718_s10 + $0x8] sm:$0xff] }
  0xa6   :  { %2035 = vmatmul.msk.f32.gmra.mxu2 %vm420_vm12, %v3035_v23  ;;  %v404_v54 = vsel %vm399_vm11, %v395_v51, %v317_v38  ;;  %v272_v13 = vperm.slane %v169_v43, 0  ;;  %v415_v11 = vsel %vm345_vm3, %v201_v55, %v336_v63  ;;  %v288_v47 = vperm.slane %v177_v61, 0 }
  0xa7   :  { %2040 = vmatmul.msk.f32.gmra.mxu3 %vm420_vm12, %v3035_v23  ;;  %579 = vmatpush.msra.mxu1 %v404_v54  ;;  %v353_v16 = vsel %vm345_vm3, %v130_v59, %v224_v4  ;;  %v304_v21 = vperm.slane %v185_v62, 0  ;;  %v320_v22 = vperm.slane %v193_v0, 0  ;;  %v200_v27 = vrot.slane %v2826_v17, 6  ;;  %v62_v62 = vld [vmem:[%s3715_s7] sm:$0xff] }
  0xa8   :  { %v362_v25 = vsel %vm354_vm4, %v353_v16, %v240_v6  ;;  %2062 = vmatpush.msk.msra.mxu0 %vm354_vm4, %v415_v11  ;;  %v215_v52 = vrot.slane %v2835_v24, 6  ;;  %v129_v28 = vrot.slane %v2851_v41, 6  ;;  %v144_v50 = vrot.slane %v2855_v42, 6 }
  0xa9   :  { %v371_v26 = vsel %vm363_vm7, %v362_v25, %v256_v10  ;;  %v152_v30 = vrot.slane %v2907_v20, 6  ;;  %v160_v31 = vrot.slane %v2903_v19, 6  ;;  %v168_v17 = vrot.slane %v2787_v3, 6 }
  0xaa   :  { %731 = vperm.xlu1 %2498, %v2923_v45   ;;  %2502 = vset.pattern.permute.xlu0 %v2801_v8  ;;  %v380_v29 = vsel %vm372_vm8, %v371_v26, %v272_v13  ;;  %v335_v1 = vperm.slane %v215_v52, 0  ;;  %v176_v24 = vrot.slane %v2792_v5, 6  ;;  %v184_v33 = vrot.slane %v2895_v9, 6 }
  0xab   :  { %750 = vperm.xlu2 %2496, %v2978_v2   ;;  %v389_v32 = vsel %vm381_vm9, %v380_v29, %v288_v47  ;;  %v192_v42 = vrot.slane %v2891_v7, 6  ;;  %v223_v34 = vperm.slane %v144_v50, 0  ;;  %v239_v37 = vperm.slane %v152_v30, 0 }
  0xac   :  { %2031 = vmatmul.msk.f32.gmra.mxu1 %vm420_vm12, %v3063_v49  ;;  %v398_v41 = vsel %vm390_vm10, %v389_v32, %v304_v21  ;;  %v414_v20 = vsel %vm345_vm3, %v200_v27, %v335_v1  ;;  %v255_v38 = vperm.slane %v160_v31, 0  ;;  %v764_v3 = vperm.slane %v2919_v36, 3 }
  0xad   :  { %2045 = vmatmul.msk.f32.gmra.mxu0 %vm420_vm12, %v3035_v23  ;;  %v407_v19 = vsel %vm399_vm11, %v398_v41, %v320_v22  ;;  %v3118_v5 = vperm.slane %v2919_v36, 5  ;;  %2057 = vmatpush.msk.msrb.mxu3 %vm354_vm4, %v414_v20  ;;  %v271_v9 = vperm.slane %v168_v17, 0  ;;  %v287_v7 = vperm.slane %v176_v24, 0 }
  0xae   :  { %2036 = vmatmul.msk.f32.gmra.mxu2 %vm420_vm12, %v3063_v49  ;;  %675 = vmatpush.msra.mxu0 %v407_v19  ;;  %v352_v39 = vsel %vm345_vm3, %v129_v28, %v223_v34  ;;  %v303_v40 = vperm.slane %v184_v33, 0  ;;  %v319_v51 = vperm.slane %v192_v42, 0  ;;  %v710_v60 = vadd.s32 24, %v2801_v8 }
  0xaf   :  { %2041 = vmatmul.msk.f32.gmra.mxu3 %vm420_vm12, %v3063_v49  ;;  %v361_v56 = vsel %vm354_vm4, %v352_v39, %v239_v37  ;;  %v2389_v37 = vld [vmem:[%s3714_s6] sm:$0xff]   ;;  %vm1195_vm3 = vcmask 1046534   ;;  %vm1197_vm4 = vcmask 1047559  }
  0xb0   :  { %v370_v53 = vsel %vm363_vm7, %v361_v56, %v255_v38  ;;  %v2390_v39 = vunpack.c.l.bf16 %v2389_v37 }
  0xb1   :  { %v379_v54 = vsel %vm372_vm8, %v370_v53, %v271_v9  ;;  %v2453_v9 = vld [vmem:[%s3714_s6 + $0x10] sm:$0xff]   ;;  %v2455_v53 = vld [vmem:[%s3714_s6 + $0x20] sm:$0xff]  }
  0xb2   :  { %2500 = vset.pattern.permute.xlu1 %v2819_v14  ;;  %794 = vperm.xlu0 %2502, %v3085_v44   ;;  %v388_v55 = vsel %vm381_vm9, %v379_v54, %v287_v7  ;;  %vm1973_vm9 = vcmask 7168  }
  0xb3   :  { %2499 = vset.pattern.permute.xlu2 %v2801_v8  ;;  %v397_v58 = vsel %vm390_vm10, %v388_v55, %v303_v40  ;;  %v3263_v40 = vld [vmem:[%s3714_s6 + $0x30] sm:$0xff]   ;;  %v2398_v55 = vunpack.c.l.bf16 %v2453_v9 }
  0xb4   :  { %2046 = vmatmul.msk.f32.vlgmr.msrb.gmra.mxu1 %vm420_vm12, %v3063_v49  ;;  %v406_v59 = vsel %vm399_vm11, %v397_v58, %v319_v51  ;;  %v2391_v51 = vunpack.c.h.bf16 %v2389_v37  ;;  %v3271_v58 = vld [vmem:[%s3714_s6 + $0x8] sm:$0xff]  }
  0xb5   :  { %2063 = vmatmul.msk.f32.vlgmr.msra.gmra.mxu0 %vm420_vm12, %v2943_v18  ;;  %643 = vmatpush.msrb.mxu3 %v406_v59 }
  0xb6   :  { %2053 = vmatmul.msk.f32.vlgmr.msrb.gmra.mxu2 %vm420_vm12, %v2943_v18 }
  0xb7   :  { %2058 = vmatmul.msk.f32.vlgmr.msrb.gmra.mxu3 %vm420_vm12, %v2943_v18 }
  0xba   :  { %775 = vperm.xlu1 %2500, %v764_v3   ;;  %819 = vperm.xlu0 %2502, %v3118_v5  }
  0xbb   :  { %769 = vperm.xlu2 %2499, %v764_v3  }
  0xbc   :  { %2048 = vmatmul.msk.f32.vlgmr.msra.gmra.mxu1 %vm420_vm12, %v2943_v18  ;;  %v864_v18 = vperm.slane %v2919_v36, 7 }
  0xbd   :  { %2064 = vmatmul.msk.f32.gmra.mxu0 %vm420_vm12, %v2997_v35 }
  0xbe   :  { %2054 = vmatmul.msk.f32.gmra.mxu2 %vm420_vm12, %v2997_v35 }
  0xbf   :  { %2059 = vmatmul.msk.f32.gmra.mxu3 %vm420_vm12, %v2997_v35 }
  0xc2   :  { %800 = vperm.xlu1 %2500, %v3085_v44   ;;  %2508 = vset.pattern.permute.xlu0 %v2967_v48 }
  0xc3   :  { %2501 = vset.pattern.permute.xlu2 %v2967_v48 }
  0xc4   :  { %2049 = vmatmul.msk.f32.gmra.mxu1 %vm420_vm12, %v2997_v35  ;;  %v1051_v35 = vld [vmem:[%s3718_s10 + $0x10] sm:$0xff] }
  0xc5   :  { %2065 = vmatmul.msk.f32.gmra.mxu0 %vm420_vm12, %v3035_v23 }
  0xc6   :  { %2055 = vmatmul.msk.f32.gmra.mxu2 %vm420_vm12, %v3035_v23 }
  0xc7   :  { %2060 = vmatmul.msk.f32.gmra.mxu3 %vm420_vm12, %v3035_v23 }
  0xca   :  { %2504 = vset.pattern.permute.xlu1 %v710_v60  ;;  %806 = vperm.xlu0 %2508, %v3085_v44  }
  0xcb   :  { %756 = vperm.xlu2 %2501, %v2978_v2  }
  0xcc   :  { %2050 = vmatmul.msk.f32.gmra.mxu1 %vm420_vm12, %v3035_v23  ;;  %v1052_v23 = vld [vmem:[%s3718_s10 + $0x18] sm:$0xff] }
  0xcd   :  { %2066 = vmatmul.msk.f32.gmra.mxu0 %vm420_vm12, %v3063_v49 }
  0xce   :  { %2056 = vmatmul.msk.f32.gmra.mxu2 %vm420_vm12, %v3063_v49 }
  0xcf   :  { %2061 = vmatmul.msk.f32.gmra.mxu3 %vm420_vm12, %v3063_v49 }
  0xd2   :  { %737 = vperm.xlu1 %2504, %v2923_v45   ;;  %2513 = vset.pattern.permute.xlu0 %v2801_v8  ;;  %v839_v45 = vperm.slane %v2919_v36, 6  ;;  %v59_v36 = vld [vmem:[%s3712_s4] sm:$0xff]  ;;  %s1982_s4 = sshll.u32 %s3722_s14, 4  ;;  %s1983_s4 = int_to_ptr.hbm [resolvable:$true] %s1982_s4 }
  0xd3   :  { %2503 = vset.pattern.permute.xlu2 %v710_v60 }
  0xd4   :  { %2051 = vmatmul.msk.f32.gmra.mxu1 %vm420_vm12, %v3063_v49 }
  0xda   :  { %2506 = vset.pattern.permute.xlu1 %v2819_v14  ;;  %869 = vperm.xlu0 %2513, %v864_v18  }
  0xdb   :  { %712 = vperm.xlu2 %2503, %v2926_v46   ;;  %v1216_v46 = vsub.f32 1.0, %v59_v36 }
  0xe2   :  { %825 = vperm.xlu1 %2506, %v3118_v5   ;;  %2517 = vset.pattern.permute.xlu0 %v2967_v48 }
  0xe3   :  { %2505 = vset.pattern.permute.xlu2 %v2967_v48 }
  0xea   :  { %2509 = vset.pattern.permute.xlu1 %v2801_v8  ;;  %881 = vperm.xlu0 %2517, %v864_v18   ;;  %v3185_v8 = vld [vmem:[%s3711_s3] sm:$0xff] }
  0xeb   :  { %781 = vperm.xlu2 %2505, %v764_v3  }
  0xf2   :  { %844 = vperm.xlu1 %2509, %v839_v45   ;;  %2520 = vset.pattern.permute.xlu0 %v2681_v12 }
  0xf3   :  { %2507 = vset.pattern.permute.xlu2 %v710_v60  ;;  %1065 = vperm.xlu0 %2520, %v1051_v35  }
  0xfa   :  { %2511 = vset.pattern.permute.xlu1 %v710_v60 }
  0xfb   :  { %762 = vperm.xlu2 %2507, %v2978_v2   ;;  %1213 = vrot.lane.b32.xlu0 %v3185_v8, %s2680_s29  ;;  %v3197_v2 = vpop.permute.xlu1 %1055 }
 0x102   :  { %787 = vperm.xlu1 %2511, %v764_v3  }
 0x103   :  { %2510 = vset.pattern.permute.xlu2 %v2819_v14  ;;  %1219 = vperm.xlu0 %2520, %v1216_v46   ;;  %v2406_v46 = vunpack.c.l.bf16 %v2455_v53 }
 0x104   :  { %v720_v49 = vpop.permute.xlu1 %719  ;;  %v701_v16 = vpop.permute.xlu0 %700 }
 0x10a   :  { %2514 = vset.pattern.permute.xlu1 %v2819_v14  ;;  %v695_v14 = vpop.permute.xlu2 %694 }
 0x10b   :  { %850 = vperm.xlu2 %2510, %v839_v45   ;;  %1225 = vperm.xlu0 %2520, %v59_v36  }
 0x10c   :  { %v745_v63 = vpop.permute.xlu1 %744 }
 0x111   :  { %v453_v61 = vpop.f32.mrf.mxu1 }
 0x112   :  { %875 = vperm.xlu1 %2514, %v864_v18   ;;  %v889_v7 = vadd.f32 %v695_v14, %v453_v61  ;;  %v2394_v61 = vunpack.c.l.bf16 %v3271_v58 }
 0x113   :  { %2512 = vset.pattern.permute.xlu2 %v2967_v48 }
 0x114   :  { %v707_v52 = vpop.permute.xlu0 %706  ;;  %v985_v35 = vadd.f32 %v2390_v39, %v889_v7 }
 0x116   :  { %2525 = vtanh.f32 %v985_v35 }
 0x118   :  { %v485_v10 = vpop.f32.mrf.mxu2 }
 0x119   :  { %v456_v4 = vpop.f32.mrf.mxu1  ;;  %v893_v54 = vadd.f32 %v720_v49, %v485_v10 }
 0x11a   :  { %2516 = vset.pattern.permute.xlu1 %v2967_v48  ;;  %v3203_v48 = vpop.permute.xlu2 %725  ;;  %v517_v11 = vpop.f32.mrf.mxu3  ;;  %v890_v56 = vadd.f32 %v701_v16, %v456_v4  ;;  %v2399_v16 = vunpack.c.h.bf16 %v2453_v9 }
 0x11b   :  { %831 = vperm.xlu2 %2512, %v3118_v5   ;;  %v549_v21 = vpop.f32.mrf.mxu0  ;;  %v897_v36 = vadd.f32 %v745_v63, %v517_v11  ;;  %v3290_v63 = vld [vmem:[%s3714_s6 + $0x28] sm:$0xff]  }
 0x11c   :  { %v3214_v6 = vpop.permute.xlu1 %731  ;;  %v2410_v9 = vunpack.c.l.bf16 %v3290_v63 }
 0x11d   :  { %v993_v37 = vadd.f32 %v2406_v46, %v897_v36  ;;  %v3320_v36 = vld [vmem:[%s3714_s6 + $0x38] sm:$0xff]  }
 0x121   :  { %v488_v22 = vpop.f32.mrf.mxu2 }
 0x122   :  { %856 = vperm.xlu1 %2516, %v839_v45   ;;  %v3209_v43 = vpop.permute.xlu2 %750  ;;  %v520_v28 = vpop.f32.mrf.mxu3  ;;  %v894_v10 = vadd.f32 %v3203_v48, %v488_v22 }
 0x123   :  { %2515 = vset.pattern.permute.xlu2 %v710_v60  ;;  %v552_v29 = vpop.f32.mrf.mxu0 }
 0x124   :  { %v3232_v31 = vpop.permute.xlu0 %794 }
 0x129   :  { %v491_v32 = vpop.f32.mrf.mxu2 }
 0x12a   :  { %2518 = vset.pattern.permute.xlu1 %v710_v60  ;;  %v770_v0 = vpop.permute.xlu2 %769  ;;  %v523_v17 = vpop.f32.mrf.mxu3  ;;  %v895_v7 = vadd.f32 %v3214_v6, %v491_v32  ;;  %v2415_v6 = vunpack.c.h.bf16 %v3263_v40  ;;  %v3309_v32 = vld [vmem:[%s3714_s6 + $0x50] sm:$0xff]  }
 0x12b   :  { %812 = vperm.xlu2 %2515, %v3085_v44   ;;  %v3236_v24 = vpop.f32.mrf.mxu0  ;;  %v901_v60 = vadd.f32 %v770_v0, %v549_v21  ;;  %v989_v0 = vadd.f32 %v2398_v55, %v893_v54  ;;  %v898_v21 = vadd.f32 %v3209_v43, %v520_v28  ;;  %v990_v43 = vadd.f32 %v2399_v16, %v894_v10 }
 0x12c   :  { %v3218_v13 = vpop.permute.xlu1 %775  ;;  %v3242_v42 = vpop.permute.xlu0 %819  ;;  %v2430_v35 = vunpack.c.l.bf16 %v3309_v32 }
 0x12d   :  { %v902_v28 = vadd.f32 %v3218_v13, %v552_v29 }
 0x131   :  { %v3246_v19 = vpop.f32.mrf.mxu2 }
 0x132   :  { %862 = vperm.xlu1 %2518, %v839_v45   ;;  %v3216_v44 = vpop.permute.xlu2 %756  ;;  %v3244_v34 = vpop.f32.mrf.mxu3 }
 0x133   :  { %837 = vperm.xlu2 %2515, %v3118_v5   ;;  %v3253_v3 = vpop.f32.mrf.mxu0  ;;  %v899_v22 = vadd.f32 %v3216_v44, %v523_v17  ;;  %v2395_v17 = vunpack.c.h.bf16 %v3271_v58 }
 0x134   :  { %v3222_v25 = vpop.permute.xlu1 %800 }
 0x139   :  { %v613_v14 = vpop.f32.mrf.mxu2 }
 0x13a   :  { %2521 = vset.pattern.permute.xlu1 %v2681_v12  ;;  %v3220_v47 = vpop.permute.xlu2 %712  ;;  %v3276_v45 = vpop.f32.mrf.mxu3 }
 0x13b   :  { %887 = vperm.xlu2 %2515, %v864_v18   ;;  %1070 = vperm.xlu1 %2521, %v1052_v23   ;;  %v2414_v18 = vunpack.c.l.bf16 %v3263_v40  ;;  %v995_v40 = vadd.f32 %v2410_v9, %v899_v22 }
 0x13c   :  { %v3273_v59 = vpop.permute.xlu0 %806 }
 0x141   :  { %v616_v29 = vpop.f32.mrf.mxu2 }
 0x142   :  { %v3322_v58 = vpop.f32.mrf.mxu3 }
 0x143   :  { %2519 = vset.pattern.permute.xlu2 %v2681_v12  ;;  %v459_v12 = vpop.f32.mrf.mxu1 }
 0x144   :  { %1060 = vperm.xlu2 %2519, %v1050_v57   ;;  %v3228_v50 = vpop.permute.xlu1 %737  ;;  %v986_v57 = vadd.f32 %v2391_v51, %v890_v56  ;;  %v891_v49 = vadd.f32 %v707_v52, %v459_v12  ;;  %v997_v12 = vadd.f32 %v2414_v18, %v901_v60  ;;  %v2407_v52 = vunpack.c.h.bf16 %v2455_v53  ;;  %v3297_v56 = vpop.f32.mrf.mxu0  ;;  %v2459_v51 = vld [vmem:[%s3714_s6 + $0x40] sm:$0xff]  }
 0x145   :  { %v3226_v27 = vpop.permute.xlu2 %781  ;;  %v2422_v13 = vunpack.c.l.bf16 %v2459_v51  ;;  %v909_v18 = vadd.f32 %v3242_v42, %v613_v14  ;;  %v2423_v46 = vunpack.c.h.bf16 %v2459_v51  ;;  %v3332_v42 = vld [vmem:[%s3714_s6 + $0x48] sm:$0xff]   ;;  %v896_v10 = vadd.f32 %v3228_v50, %v3246_v19 }
 0x146   :  { %2527 = vtanh.f32 %v986_v57  ;;  %v987_v48 = vadd.f32 %v2394_v61, %v891_v49  ;;  %v994_v44 = vadd.f32 %v2407_v52, %v898_v21  ;;  %v2418_v21 = vunpack.c.l.bf16 %v3320_v36 }
 0x147   :  { %2529 = vtanh.f32 %v989_v0  ;;  %v2426_v19 = vunpack.c.l.bf16 %v3332_v42  ;;  %v2431_v51 = vunpack.c.h.bf16 %v3309_v32 }
 0x148   :  { %2531 = vtanh.f32 %v997_v12  ;;  %v903_v12 = vadd.f32 %v3226_v27, %v3236_v24  ;;  %v3362_v24 = vld [vmem:[%s3714_s6 + $0x78] sm:$0xff]  }
 0x149   :  { %2533 = vtanh.f32 %v993_v37 }
 0x14a   :  { %2535 = vtanh.f32 %v987_v48 }
 0x14b   :  { %v3224_v26 = vpop.f32.mrf.mxu1  ;;  %2537 = vtanh.f32 %v990_v43 }
 0x14c   :  { %64 = vperm.xlu2 %2519, %v62_v62   ;;  %v3282_v62 = vld [vmem:[%s3714_s6 + $0x18] sm:$0xff]   ;;  %v870_v53 = vpop.permute.xlu0 %869  ;;  %v892_v54 = vadd.f32 %v3220_v47, %v3224_v26  ;;  %v3326_v26 = vpop.eup %2525  ;;  %2539 = vtanh.f32 %v994_v44 }
 0x14d   :  { %v2402_v39 = vunpack.c.l.bf16 %v3282_v62  ;;  %v3336_v49 = vpop.eup %2527  ;;  %v2403_v0 = vunpack.c.h.bf16 %v3282_v62  ;;  %v1005_v62 = vadd.f32 %v2430_v35, %v909_v18  ;;  %v683_v27 = vpop.f32.mrf.mxu0 }
 0x14e   :  { %v988_v61 = vadd.f32 %v2395_v17, %v892_v54  ;;  %v619_v17 = vpop.f32.mrf.mxu2 }
 0x14f   :  { %v991_v55 = vadd.f32 %v2402_v39, %v895_v7  ;;  %v917_v39 = vadd.f32 %v870_v53, %v3253_v3  ;;  %v2463_v3 = vld [vmem:[%s3714_s6 + $0x60] sm:$0xff]   ;;  %v2411_v53 = vunpack.c.h.bf16 %v3290_v63 }
 0x151   :  { %2541 = vtanh.f32 %v991_v55 }
 0x152   :  { %2543 = vtanh.f32 %v995_v40 }
 0x153   :  { %v3234_v1 = vpop.f32.mrf.mxu1 }
 0x154   :  { %v3238_v41 = vpop.permute.xlu1 %825 }
 0x155   :  { %v3230_v30 = vpop.permute.xlu2 %762  ;;  %v910_v43 = vadd.f32 %v3238_v41, %v616_v29  ;;  %v2450_v41 = vunpack.c.l.bf16 %v3362_v24 }
 0x156   :  { %v900_v44 = vadd.f32 %v3230_v30, %v3244_v34  ;;  %v2438_v30 = vunpack.c.l.bf16 %v2463_v3 }
 0x15b   :  { %v581_v20 = vpop.f32.mrf.mxu1 }
 0x15c   :  { %v905_v60 = vadd.f32 %v3232_v31, %v581_v20  ;;  %v998_v31 = vadd.f32 %v2415_v6, %v902_v28  ;;  %v882_v22 = vpop.permute.xlu0 %881  ;;  %v999_v6 = vadd.f32 %v2418_v21, %v903_v12 }
 0x15d   :  { %v919_v55 = vadd.f32 %v882_v22, %v683_v27 }
 0x15e   :  { %v1001_v16 = vadd.f32 %v2422_v13, %v905_v60  ;;  %2545 = vtanh.f32 %v998_v31  ;;  %v651_v60 = vpop.f32.mrf.mxu3  ;;  %v3382_v13 = vld [vmem:[%s3714_s6 + $0x68] sm:$0xff]   ;;  %v1006_v31 = vadd.f32 %v2431_v51, %v910_v43 }
 0x15f   :  { %2547 = vtanh.f32 %v988_v61  ;;  %v996_v61 = vadd.f32 %v2411_v53, %v900_v44 }
 0x160   :  { %2549 = vtanh.f32 %v1001_v16 }
 0x161   :  { %2551 = vtanh.f32 %v1005_v62 }
 0x163   :  { %v584_v23 = vpop.f32.mrf.mxu1 }
 0x164   :  { %v3251_v38 = vpop.permute.xlu1 %844  ;;  %v906_v20 = vadd.f32 %v3222_v25, %v584_v23  ;;  %v3344_v25 = vld [vmem:[%s3714_s6 + $0x70] sm:$0xff]   ;;  %v3346_v23 = vpop.eup %2529 }
 0x165   :  { %v3240_v33 = vpop.permute.xlu2 %850  ;;  %v3351_v52 = vpop.eup %2531  ;;  %v2446_v48 = vunpack.c.l.bf16 %v3344_v25  ;;  %v913_v34 = vadd.f32 %v3251_v38, %v3276_v45  ;;  %v1015_v45 = vadd.f32 %v2450_v41, %v919_v55  ;;  %v2447_v12 = vunpack.c.h.bf16 %v3344_v25 }
 0x166   :  { %v3355_v37 = vpop.eup %2533  ;;  %v1002_v7 = vadd.f32 %v2423_v46, %v906_v20  ;;  %v2439_v20 = vunpack.c.h.bf16 %v2463_v3  ;;  %v914_v46 = vadd.f32 %v3240_v33, %v3322_v58  ;;  %v1077_v43 = vmul.f32 %v3346_v23, %v3197_v2 }
 0x167   :  { %v3364_v9 = vpop.eup %2535  ;;  %v1013_v63 = vadd.f32 %v2446_v48, %v917_v39  ;;  %v1009_v21 = vadd.f32 %v2438_v30, %v913_v34  ;;  %v2427_v3 = vunpack.c.h.bf16 %v3332_v42 }
 0x168   :  { %v3371_v28 = vpop.eup %2537  ;;  %2553 = vtanh.f32 %v1002_v7 }
 0x169   :  { %v3376_v54 = vpop.eup %2539 }
 0x16a   :  { %v3384_v40 = vpop.eup %2541 }
 0x16b   :  { %v587_v57 = vpop.f32.mrf.mxu1  ;;  %v2544_v35 = vpop.eup %2543 }
 0x16c   :  { %v907_v50 = vadd.f32 %v3273_v59, %v587_v57  ;;  %v992_v59 = vadd.f32 %v2403_v0, %v896_v10  ;;  %v3390_v57 = vpop.eup %2545  ;;  %v2462_v0 = vld [vmem:[%s3714_s6 + $0x58] sm:$0xff]   ;;  %v2442_v10 = vunpack.c.l.bf16 %v3382_v13  ;;  %s2682_s6 = smov [#allocation5]  }
 0x16d   :  { %v3396_v38 = vpop.eup %2547  ;;  %v2435_v44 = vunpack.c.h.bf16 %v2462_v0  ;;  %s1991_s24 = sshll.u32 %s2682_s6, 4  ;;  %s1992_s24 = int_to_ptr.vmem [resolvable:$true] %s1991_s24 }
 0x16e   :  { %v1003_v32 = vadd.f32 %v2426_v19, %v907_v50  ;;  %2555 = vtanh.f32 %v992_v59  ;;  %v3401_v58 = vpop.eup %2549  ;;  %v1010_v50 = vadd.f32 %v2439_v20, %v914_v46  ;;  %v2434_v19 = vunpack.c.l.bf16 %v2462_v0  ;;  %v622_v59 = vpop.f32.mrf.mxu2 }
 0x16f   :  { %2557 = vtanh.f32 %v999_v6  ;;  %v3403_v62 = vpop.eup %2551  ;;  %v686_v6 = vpop.f32.mrf.mxu0 }
 0x170   :  { %2559 = vtanh.f32 %v1003_v32  ;;  %v2554_v39 = vpop.eup %2553  ;;  %v654_v20 = vpop.f32.mrf.mxu3 }
 0x171   :  { %2561 = vtanh.f32 %v1013_v63 }
 0x172   :  { %2563 = vtanh.f32 %v1006_v31 }
 0x173   :  { %2565 = vtanh.f32 %v996_v61  ;;  %v590_v48 = vpop.f32.mrf.mxu1  ;;  %v2443_v61 = vunpack.c.h.bf16 %v3382_v13  ;;  %v1093_v13 = vmul.f32 %v3403_v62, %v3197_v2 }
 0x174   :  { %v3284_v4 = vpop.permute.xlu1 %787  ;;  %v3406_v27 = vpop.eup %2555  ;;  %2567 = vtanh.f32 %v1015_v45 }
 0x175   :  { %v3255_v5 = vpop.permute.xlu2 %831  ;;  %v3411_v51 = vpop.eup %2557  ;;  %2569 = vtanh.f32 %v1009_v21 }
 0x176   :  { %v911_v7 = vadd.f32 %v3255_v5, %v619_v17  ;;  %v1081_v5 = vmul.f32 %v3355_v37, %v3197_v2  ;;  %v3418_v53 = vpop.eup %2559  ;;  %2571 = vtanh.f32 %v1010_v50 }
 0x177   :  { %v2562_v32 = vpop.eup %2561 }
 0x178   :  { %v2564_v42 = vpop.eup %2563 }
 0x179   :  { %v3427_v63 = vpop.eup %2565 }
 0x17a   :  { %v2568_v31 = vpop.eup %2567 }
 0x184   :  { %v3324_v47 = vpop.permute.xlu1 %875 }
 0x185   :  { %v3292_v11 = vpop.permute.xlu2 %812  ;;  %v918_v33 = vadd.f32 %v3324_v47, %v3297_v56  ;;  %v2419_v56 = vunpack.c.h.bf16 %v3320_v36  ;;  %v904_v47 = vadd.f32 %v3284_v4, %v3234_v1  ;;  %v3420_v36 = vpop.permute.xlu0 %1065  ;;  %v1007_v1 = vadd.f32 %v2434_v19, %v911_v7 }
 0x186   :  { %v908_v4 = vadd.f32 %v3292_v11, %v590_v48  ;;  %v1079_v11 = vmul.f32 %v3384_v40, %v3420_v36  ;;  %v1083_v30 = vmul.f32 %v2544_v35, %v3420_v36  ;;  %v1089_v7 = vmul.f32 %v3401_v58, %v3197_v2 }
 0x187   :  { %v1014_v25 = vadd.f32 %v2447_v12, %v918_v33  ;;  %v1000_v41 = vadd.f32 %v2419_v56, %v904_v47  ;;  %v1101_v48 = vmul.f32 %v2562_v32, %v3197_v2  ;;  %v1075_v62 = vmul.f32 %v3364_v9, %v3420_v36 }
 0x18d   :  { %v3334_v14 = vpop.permute.xlu2 %837 }
 0x18e   :  { %v912_v23 = vadd.f32 %v3334_v14, %v622_v59 }
 0x190   :  { %v1008_v46 = vadd.f32 %v2435_v44, %v912_v23 }
 0x194   :  { %v857_v29 = vpop.permute.xlu1 %856 }
 0x195   :  { %v888_v18 = vpop.permute.xlu2 %887  ;;  %v915_v16 = vadd.f32 %v857_v29, %v651_v60  ;;  %v2451_v29 = vunpack.c.h.bf16 %v3362_v24  ;;  %v2570_v24 = vpop.eup %2569 }
 0x196   :  { %v920_v60 = vadd.f32 %v888_v18, %v686_v6  ;;  %v1004_v18 = vadd.f32 %v2427_v3, %v908_v4  ;;  %v1091_v3 = vmul.f32 %v3418_v53, %v3420_v36 }
 0x197   :  { %v1011_v22 = vadd.f32 %v2442_v10, %v915_v16  ;;  %v2572_v10 = vpop.eup %2571 }
 0x198   :  { %v1016_v35 = vadd.f32 %v2451_v29, %v920_v60 }
 0x199   :  { %2573 = vtanh.f32 %v1011_v22 }
 0x19a   :  { %2575 = vtanh.f32 %v1014_v25 }
 0x19b   :  { %2577 = vtanh.f32 %v1007_v1 }
 0x19c   :  { %2579 = vtanh.f32 %v1000_v41 }
 0x19d   :  { %2581 = vtanh.f32 %v1004_v18 }
 0x19e   :  { %v1061_v17 = vpop.permute.xlu2 %1060  ;;  %2583 = vtanh.f32 %v1008_v46 }
 0x19f   :  { %v1078_v37 = vmul.f32 %v3371_v28, %v1061_v17  ;;  %v1082_v55 = vmul.f32 %v3376_v54, %v1061_v17  ;;  %v1073_v28 = vmul.f32 %v3326_v26, %v3197_v2  ;;  %v1085_v54 = vmul.f32 %v3351_v52, %v3197_v2  ;;  %v2574_v12 = vpop.eup %2573 }
 0x1a0   :  { %v1074_v16 = vmul.f32 %v3336_v49, %v1061_v17  ;;  %v1086_v45 = vmul.f32 %v3390_v57, %v1061_v17  ;;  %v1090_v33 = vmul.f32 %v2554_v39, %v1061_v17  ;;  %v1094_v52 = vmul.f32 %v2564_v42, %v1061_v17  ;;  %v2576_v19 = vpop.eup %2575 }
 0x1a1   :  { %v1114_v34 = vadd.f32 %v1078_v37, %v1077_v43  ;;  %v1123_v14 = vadd.f32 %v1082_v55, %v1081_v5  ;;  %v1098_v21 = vmul.f32 %v2572_v10, %v1061_v17  ;;  %v1097_v49 = vmul.f32 %v2570_v24, %v3197_v2  ;;  %v2578_v56 = vpop.eup %2577 }
 0x1a2   :  { %v1102_v22 = vmul.f32 %v2576_v19, %v1061_v17  ;;  %v1099_v39 = vmul.f32 %v2574_v12, %v3420_v36  ;;  %2585 = vtanh.f32 %v1016_v35  ;;  %v1105_v47 = vadd.f32 %v1074_v16, %v1073_v28  ;;  %v2580_v5 = vpop.eup %2579 }
 0x1a3   :  { %v1115_v0 = vadd.f32 %v1114_v34, %v1079_v11  ;;  %v1124_v40 = vadd.f32 %v1123_v14, %v1083_v30  ;;  %v1132_v25 = vadd.f32 %v1086_v45, %v1085_v54  ;;  %v1141_v59 = vadd.f32 %v1090_v33, %v1089_v7  ;;  %v2582_v4 = vpop.eup %2581 }
 0x1a4   :  { %v863_v26 = vpop.permute.xlu1 %862  ;;  %v1150_v58 = vadd.f32 %v1094_v52, %v1093_v13  ;;  %v1159_v43 = vadd.f32 %v1098_v21, %v1097_v49  ;;  %v1087_v2 = vmul.f32 %v3411_v51, %v3420_v36  ;;  %v1095_v6 = vmul.f32 %v2578_v56, %v3420_v36  ;;  %v2584_v32 = vpop.eup %2583 }
 0x1a5   :  { %v916_v50 = vadd.f32 %v863_v26, %v654_v20  ;;  %v1168_v1 = vadd.f32 %v1102_v22, %v1101_v48  ;;  %v1106_v44 = vadd.f32 %v1105_v47, %v1075_v62  ;;  %v1103_v17 = vmul.f32 %v2568_v31, %v3420_v36 }
 0x1a6   :  { %v1133_v37 = vadd.f32 %v1132_v25, %v1087_v2  ;;  %v1142_v55 = vadd.f32 %v1141_v59, %v1091_v3  ;;  %v1151_v42 = vadd.f32 %v1150_v58, %v1095_v6  ;;  %v1160_v41 = vadd.f32 %v1159_v43, %v1099_v39 }
 0x1a7   :  { %v1012_v57 = vadd.f32 %v2443_v61, %v916_v50  ;;  %v1169_v28 = vadd.f32 %v1168_v1, %v1103_v17 }
 0x1a8   :  { %v2586_v9 = vpop.eup %2585 }
 0x1a9   :  { %2587 = vtanh.f32 %v1012_v57 }
 0x1ad   :  { %v1071_v23 = vpop.permute.xlu1 %1070 }
 0x1ae   :  { %v1076_v60 = vmul.f32 %v3396_v38, %v1071_v23  ;;  %v1080_v51 = vmul.f32 %v3406_v27, %v1071_v23  ;;  %v1084_v53 = vmul.f32 %v3427_v63, %v1071_v23  ;;  %v1088_v29 = vmul.f32 %v2580_v5, %v1071_v23 }
 0x1af   :  { %v2588_v11 = vpop.eup %2587  ;;  %v1092_v30 = vmul.f32 %v2582_v4, %v1071_v23  ;;  %v1096_v34 = vmul.f32 %v2584_v32, %v1071_v23  ;;  %v1104_v14 = vmul.f32 %v2586_v9, %v1071_v23 }
 0x1b0   :  { %v1107_v36 = vadd.f32 %v1106_v44, %v1076_v60  ;;  %v1116_v31 = vadd.f32 %v1115_v0, %v1080_v51  ;;  %v1125_v54 = vadd.f32 %v1124_v40, %v1084_v53  ;;  %v1100_v18 = vmul.f32 %v2588_v11, %v1071_v23 }
 0x1b1   :  { %v1134_v20 = vadd.f32 %v1133_v37, %v1088_v29  ;;  %v1143_v24 = vadd.f32 %v1142_v55, %v1092_v30  ;;  %v1152_v46 = vadd.f32 %v1151_v42, %v1096_v34  ;;  %v1170_v61 = vadd.f32 %v1169_v28, %v1104_v14  ;;  %v65_v30 = vpop.permute.xlu2 %64 }
 0x1b2   :  { %v1108_v10 = vrot.slane %v1107_v36, 4  ;;  %v1117_v38 = vrot.slane %v1116_v31, 4  ;;  %v1126_v35 = vrot.slane %v1125_v54, 4  ;;  %v1161_v27 = vadd.f32 %v1160_v41, %v1100_v18 }
 0x1b3   :  { %v1135_v16 = vrot.slane %v1134_v20, 4  ;;  %v1144_v63 = vrot.slane %v1143_v24, 4  ;;  %v1153_v45 = vrot.slane %v1152_v46, 4  ;;  %v1171_v26 = vrot.slane %v1170_v61, 4 }
 0x1b4   :  { %v1109_v12 = vadd.f32 %v1108_v10, %v1107_v36  ;;  %v1118_v33 = vadd.f32 %v1117_v38, %v1116_v31  ;;  %v1127_v52 = vadd.f32 %v1126_v35, %v1125_v54  ;;  %v1162_v21 = vrot.slane %v1161_v27, 4  ;;  %v1214_v10 = vpop.permute.xlu0 %1213  ;;  %v2331_v38 = vld [vmem:[%s3713_s5 + $0x38] sm:$0xff] }
 0x1b5   :  { %v1136_v50 = vadd.f32 %v1135_v16, %v1134_v20  ;;  %v1145_v0 = vadd.f32 %v1144_v63, %v1143_v24  ;;  %v1154_v40 = vadd.f32 %v1153_v45, %v1152_v46  ;;  %v1172_v19 = vadd.f32 %v1171_v26, %v1170_v61  ;;  %v2339_v35 = vld [vmem:[%s3713_s5 + $0x78] sm:$0xff]  ;;  %1436 = vmatpush.bf16.msrb.mxu1 %v2331_v38  ;;  %v2330_v63 = vld [vmem:[%s3713_s5 + $0x30] sm:$0xff] }
 0x1b6   :  { %v1110_v7 = vrot.slane %v1109_v12, 2  ;;  %v1119_v13 = vrot.slane %v1118_v33, 2  ;;  %v1128_v48 = vrot.slane %v1127_v52, 2  ;;  %v1163_v49 = vadd.f32 %v1162_v21, %v1161_v27  ;;  %v2347_v27 = vld [vmem:[%s3713_s5 + $0xb8] sm:$0xff]  ;;  %1497 = vmatpush.bf16.msra.mxu2 %v2339_v35  ;;  %v2338_v45 = vld [vmem:[%s3713_s5 + $0x70] sm:$0xff] }
 0x1b7   :  { %v1137_v57 = vrot.slane %v1136_v50, 2  ;;  %v1146_v22 = vrot.slane %v1145_v0, 2  ;;  %v1155_v56 = vrot.slane %v1154_v40, 2  ;;  %v1173_v39 = vrot.slane %v1172_v19, 2  ;;  %v2355_v16 = vld [vmem:[%s3713_s5 + $0xf8] sm:$0xff]  ;;  %1558 = vmatpush.bf16.msra.mxu3 %v2347_v27  ;;  %v2346_v26 = vld [vmem:[%s3713_s5 + $0xb0] sm:$0xff] }
 0x1b8   :  { %v1111_v47 = vadd.f32 %v1110_v7, %v1109_v12  ;;  %v1120_v25 = vadd.f32 %v1119_v13, %v1118_v33  ;;  %v1129_v59 = vadd.f32 %v1128_v48, %v1127_v52  ;;  %v1164_v58 = vrot.slane %v1163_v49, 2  ;;  %1619 = vmatpush.bf16.msrb.mxu0 %v2355_v16  ;;  %v2354_v12 = vld [vmem:[%s3713_s5 + $0xf0] sm:$0xff]  ;;  %v2329_v33 = vld [vmem:[%s3713_s5 + $0x28] sm:$0xff]  ;;  %v2344_v7 = vld [vmem:[%s3713_s5 + $0xa0] sm:$0xff] }
 0x1b9   :  { %v1138_v43 = vadd.f32 %v1137_v57, %v1136_v50  ;;  %v1147_v5 = vadd.f32 %v1146_v22, %v1145_v0  ;;  %v1156_v62 = vadd.f32 %v1155_v56, %v1154_v40  ;;  %v1174_v2 = vadd.f32 %v1173_v39, %v1172_v19  ;;  %1437 = vmatpush.bf16.msrb.mxu1 %v2330_v63  ;;  %v2337_v52 = vld [vmem:[%s3713_s5 + $0x68] sm:$0xff]  ;;  %v2328_v40 = vld [vmem:[%s3713_s5 + $0x20] sm:$0xff]  ;;  %v2327_v48 = vld [vmem:[%s3713_s5 + $0x18] sm:$0xff] }
 0x1ba   :  { %v1112_v3 = vrot.slane %v1111_v47, 1  ;;  %v1121_v6 = vrot.slane %v1120_v25, 1  ;;  %v1130_v1 = vrot.slane %v1129_v59, 1  ;;  %v1165_v4 = vadd.f32 %v1164_v58, %v1163_v49  ;;  %1498 = vmatpush.bf16.msra.mxu2 %v2338_v45  ;;  %v2345_v50 = vld [vmem:[%s3713_s5 + $0xa8] sm:$0xff]  ;;  %v2336_v19 = vld [vmem:[%s3713_s5 + $0x60] sm:$0xff]  ;;  %v2335_v49 = vld [vmem:[%s3713_s5 + $0x58] sm:$0xff] }
 0x1bb   :  { %v1139_v44 = vrot.slane %v1138_v43, 1  ;;  %v1148_v17 = vrot.slane %v1147_v5, 1  ;;  %v1157_v55 = vrot.slane %v1156_v62, 1  ;;  %v1175_v9 = vrot.slane %v1174_v2, 1  ;;  %1559 = vmatpush.bf16.msra.mxu3 %v2346_v26  ;;  %v2353_v0 = vld [vmem:[%s3713_s5 + $0xe8] sm:$0xff]  ;;  %v2352_v13 = vld [vmem:[%s3713_s5 + $0xe0] sm:$0xff] }
 0x1bc   :  { %v1113_v32 = vadd.f32 %v1112_v3, %v1111_v47  ;;  %v1122_v23 = vadd.f32 %v1121_v6, %v1120_v25  ;;  %v1131_v37 = vadd.f32 %v1130_v1, %v1129_v59  ;;  %v1166_v42 = vrot.slane %v1165_v4, 1  ;;  %v1220_v21 = vpop.permute.xlu0 %1219  ;;  %1620 = vmatpush.bf16.msrb.mxu0 %v2354_v12  ;;  %v2343_v57 = vld [vmem:[%s3713_s5 + $0x98] sm:$0xff]  ;;  %v2326_v39 = vld [vmem:[%s3713_s5 + $0x10] sm:$0xff]  ;;  %v2341_v3 = vld [vmem:[%s3713_s5 + $0x88] sm:$0xff] }
 0x1bd   :  { %v1140_v41 = vadd.f32 %v1139_v44, %v1138_v43  ;;  %v1149_v51 = vadd.f32 %v1148_v17, %v1147_v5  ;;  %v1158_v29 = vadd.f32 %v1157_v55, %v1156_v62  ;;  %v1176_v28 = vadd.f32 %v1175_v9, %v1174_v2  ;;  %1438 = vmatpush.bf16.msrb.mxu1 %v2329_v33  ;;  %v2334_v47 = vld [vmem:[%s3713_s5 + $0x50] sm:$0xff]  ;;  %v2325_v62 = vld [vmem:[%s3713_s5 + $0x8] sm:$0xff]  ;;  %v2324_v1 = vld [vmem:[%s3713_s5] sm:$0xff] }
 0x1be   :  { %v1186_v60 = vsel %vm1185_vm13, %v1122_v23, %v1113_v32  ;;  %v1167_v34 = vadd.f32 %v1166_v42, %v1165_v4  ;;  %vm66_vm5 = vcmp.ge.s32.totalorder %v2823_v15, %v65_v30  ;;  %1499 = vmatpush.bf16.msra.mxu2 %v2337_v52  ;;  %v2351_v15 = vld [vmem:[%s3713_s5 + $0xd8] sm:$0xff]  ;;  %v1215_v22 = vsel %vm1212_vm6, 0.0, %v1214_v10  ;;  %v2342_v25 = vld [vmem:[%s3713_s5 + $0x90] sm:$0xff]  ;;  %v2333_v2 = vld [vmem:[%s3713_s5 + $0x48] sm:$0xff] }
 0x1bf   :  { %v1188_v53 = vsel %vm1187_vm14, %v1131_v37, %v1186_v60  ;;  %1560 = vmatpush.bf16.msra.mxu3 %v2345_v50  ;;  %v2350_v59 = vld [vmem:[%s3713_s5 + $0xd0] sm:$0xff]  ;;  %v1222_v58 = vmul.f32 %v1220_v21, %v3185_v8  ;;  %v2349_v8 = vld [vmem:[%s3713_s5 + $0xc8] sm:$0xff]  ;;  %v2332_v4 = vld [vmem:[%s3713_s5 + $0x40] sm:$0xff] }
 0x1c0   :  { %v1190_v11 = vsel %vm1189_vm15, %v1140_v41, %v1188_v53  ;;  %1621 = vmatpush.bf16.msrb.mxu0 %v2353_v0  ;;  %v2363_v17 = vld [vmem:[%s3713_s5 + $0x138] sm:$0xff]  ;;  %v2340_v32 = vld [vmem:[%s3713_s5 + $0x80] sm:$0xff]  ;;  %v2378_v30 = vld [vmem:[%s3713_s5 + $0x1b0] sm:$0xff] }
 0x1c1   :  { %v1192_v14 = vsel %vm1191_vm1, %v1149_v51, %v1190_v11  ;;  %1439 = vmatpush.bf16.msrb.mxu1 %v2328_v40  ;;  %v2348_v55 = vld [vmem:[%s3713_s5 + $0xc0] sm:$0xff]  ;;  %v2371_v42 = vld [vmem:[%s3713_s5 + $0x178] sm:$0xff]  ;;  %v2370_v11 = vld [vmem:[%s3713_s5 + $0x170] sm:$0xff] }
 0x1c2   :  { %v1194_v36 = vsel %vm1193_vm2, %v1158_v29, %v1192_v14  ;;  %1500 = vmatpush.bf16.msra.mxu2 %v2336_v19  ;;  %v2379_v41 = vld [vmem:[%s3713_s5 + $0x1b8] sm:$0xff]  ;;  %v2599_v51 = vld [vmem:[%s3710_s2] sm:$0xff]  ;;  %v2362_v29 = vld [vmem:[%s3713_s5 + $0x130] sm:$0xff] }
 0x1c3   :  { %v1196_v31 = vsel %vm1195_vm3, %v1167_v34, %v1194_v36  ;;  %1561 = vmatpush.bf16.msra.mxu3 %v2344_v7  ;;  %v2387_v60 = vld [vmem:[%s3713_s5 + $0x1f8] sm:$0xff]  ;;  %v2386_v34 = vld [vmem:[%s3713_s5 + $0x1f0] sm:$0xff]  ;;  %v2361_v14 = vld [vmem:[%s3713_s5 + $0x128] sm:$0xff] }
 0x1c4   :  { %v1198_v54 = vsel %vm1197_vm4, %v1176_v28, %v1196_v31  ;;  %1622 = vmatpush.bf16.msrb.mxu0 %v2352_v13  ;;  %v1226_v56 = vpop.permute.xlu0 %1225  ;;  %v2369_v28 = vld [vmem:[%s3713_s5 + $0x168] sm:$0xff]  ;;  %v2375_v10 = vld [vmem:[%s3713_s5 + $0x198] sm:$0xff]  ;;  %v2358_v35 = vld [vmem:[%s3713_s5 + $0x110] sm:$0xff] }
 0x1c5   :  { %v1200_v18 = vsel %vm66_vm5, -1e+30, %v1198_v54  ;;  %1440 = vmatpush.bf16.msrb.mxu1 %v2327_v48  ;;  %v1228_v43 = vmul.f32 %v1226_v56, %v1215_v22  ;;  %v2377_v36 = vld [vmem:[%s3713_s5 + $0x1a8] sm:$0xff]  ;;  %v2360_v54 = vld [vmem:[%s3713_s5 + $0x120] sm:$0xff]  ;;  %v2383_v38 = vld [vmem:[%s3713_s5 + $0x1d8] sm:$0xff] }
 0x1c6   :  { %1201 = vmax.xlane.f32.xlu1 %v1200_v18  ;;  %1501 = vmatpush.bf16.msra.mxu2 %v2335_v49  ;;  %v2385_v31 = vld [vmem:[%s3713_s5 + $0x1e8] sm:$0xff]  ;;  %v2366_v27 = vld [vmem:[%s3713_s5 + $0x150] sm:$0xff]  ;;  %v2356_v21 = vld [vmem:[%s3713_s5 + $0x100] sm:$0xff] }
 0x1c7   :  { %1562 = vmatpush.bf16.msra.mxu3 %v2343_v57  ;;  %v1229_v6 = vadd.f32 %v1228_v43, %v1222_v58  ;;  %v2374_v16 = vld [vmem:[%s3713_s5 + $0x190] sm:$0xff]  ;;  %v2357_v45 = vld [vmem:[%s3713_s5 + $0x108] sm:$0xff]  ;;  %v2364_v50 = vld [vmem:[%s3713_s5 + $0x140] sm:$0xff] }
 0x1c8   :  { %1623 = vmatpush.bf16.msrb.mxu0 %v2351_v15  ;;  %v2382_v63 = vld [vmem:[%s3713_s5 + $0x1d0] sm:$0xff]  ;;  %v2365_v26 = vld [vmem:[%s3713_s5 + $0x148] sm:$0xff]  ;;  %v2372_v0 = vld [vmem:[%s3713_s5 + $0x180] sm:$0xff] }
 0x1c9   :  { %1441 = vmatpush.bf16.msrb.mxu1 %v2326_v39  ;;  %v1230_v23 = vadd.f32 1e-08, %v1229_v6  ;;  %v2373_v12 = vld [vmem:[%s3713_s5 + $0x188] sm:$0xff]  ;;  %v2380_v40 = vld [vmem:[%s3713_s5 + $0x1c0] sm:$0xff] }
 0x1ca   :  { %1502 = vmatpush.bf16.msra.mxu2 %v2334_v47  ;;  %v2381_v33 = vld [vmem:[%s3713_s5 + $0x1c8] sm:$0xff]  ;;  %v2600_v6 = vld [vmem:[%s3730_s27] sm:$0xff]  ;;  %s1993_s27 = sshll.u32 %s3723_s15, 4  ;;  %s2002_s15 = sshll.u32 %s2684_s30, 4  ;;  %s1994_s27 = int_to_ptr.hbm [resolvable:$true] %s1993_s27  ;;  %s2003_s15 = int_to_ptr.vmem [resolvable:$true] %s2002_s15 }
 0x1cb   :  { %1563 = vmatpush.bf16.msra.mxu3 %v2342_v25 }
 0x1cc   :  { %1624 = vmatpush.bf16.msrb.mxu0 %v2350_v59 }
 0x1cd   :  { %1442 = vmatpush.bf16.msrb.mxu1 %v2325_v62 }
 0x1ce   :  { %1503 = vmatpush.bf16.msra.mxu2 %v2333_v2 }
 0x1cf   :  { %1564 = vmatpush.bf16.msra.mxu3 %v2341_v3  ;;  %v2523_v3 = vld [vmem:[%s3720_s12] ss:$0 sm:$0xff] }
 0x1d0   :  { %1625 = vmatpush.bf16.msrb.mxu0 %v2349_v8 }
 0x1d1   :  { %1443 = vmatpush.bf16.msrb.mxu1 %v2324_v1  ;;  %v1943_v1 = vmul.f32 %v2600_v6, %v2523_v3 }
 0x1d2   :  { %1504 = vmatpush.bf16.msra.mxu2 %v2332_v4 }
 0x1d3   :  { %1565 = vmatpush.bf16.msra.mxu3 %v2340_v32  ;;  %v1944_v4 = vsel %vm71_vm0, %v1943_v1, 0.0  ;;  %vm1899_vm0 = vcmask 130048  }
 0x1d4   :  { %1626 = vmatpush.bf16.msrb.mxu0 %v2348_v55  ;;  %1945 = vadd.xlane.f32.xlu1 %v1944_v4 }
 0x1d5   :  { %1680 = vmatpush.bf16.msra.mxu1 %v2363_v17 }
 0x1d6   :  { %1741 = vmatpush.bf16.msrb.mxu2 %v2371_v42 }
 0x1d7   :  { %1802 = vmatpush.bf16.msrb.mxu3 %v2379_v41 }
 0x1d8   :  { %1863 = vmatpush.bf16.msra.mxu0 %v2387_v60 }
 0x1d9   :  { %1681 = vmatpush.bf16.msra.mxu1 %v2362_v29 }
 0x1da   :  { %1742 = vmatpush.bf16.msrb.mxu2 %v2370_v11 }
 0x1db   :  { %1803 = vmatpush.bf16.msrb.mxu3 %v2378_v30 }
 0x1dc   :  { %1864 = vmatpush.bf16.msra.mxu0 %v2386_v34 }
 0x1dd   :  { %1682 = vmatpush.bf16.msra.mxu1 %v2361_v14 }
 0x1de   :  { %1743 = vmatpush.bf16.msrb.mxu2 %v2369_v28 }
 0x1df   :  { %1804 = vmatpush.bf16.msrb.mxu3 %v2377_v36 }
 0x1e0   :  { %1865 = vmatpush.bf16.msra.mxu0 %v2385_v31 }
 0x1e1   :  { %1683 = vmatpush.bf16.msra.mxu1 %v2360_v54 }
 0x239   :  { %v1202_v20 = vpop.xlane.xlu1 %1201 }
 0x23a   :  { %v1203_v24 = vsub.f32 %v1200_v18, %v1202_v20  ;;  %v2368_v18 = vld [vmem:[%s3713_s5 + $0x160] sm:$0xff] }
 0x23b   :  { %v2376_v20 = vld [vmem:[%s3713_s5 + $0x1a0] sm:$0xff]  ;;  %1744 = vmatpush.bf16.msrb.mxu2 %v2368_v18 }
 0x23c   :  { %v1204_v46 = vmul.f32 1.442695, %v1203_v24  ;;  %v2384_v24 = vld [vmem:[%s3713_s5 + $0x1e0] sm:$0xff]  ;;  %1805 = vmatpush.bf16.msrb.mxu3 %v2376_v20 }
 0x23d   :  { %1866 = vmatpush.bf16.msra.mxu0 %v2384_v24 }
 0x23e   :  { %2589 = vpow2.f32 %v1204_v46  ;;  %v2359_v46 = vld [vmem:[%s3713_s5 + $0x118] sm:$0xff] }
 0x23f   :  { %1684 = vmatpush.bf16.msra.mxu1 %v2359_v46 }
 0x240   :  { %1806 = vmatpush.bf16.msrb.mxu3 %v2375_v10 }
 0x241   :  { %1867 = vmatpush.bf16.msra.mxu0 %v2383_v38 }
 0x243   :  { %1685 = vmatpush.bf16.msra.mxu1 %v2358_v35 }
 0x244   :  { %v3465_v61 = vpop.eup %2589  ;;  %1807 = vmatpush.bf16.msrb.mxu3 %v2374_v16 }
 0x245   :  { %1206 = vadd.xlane.f32.xlu2 %v3465_v61  ;;  %1868 = vmatpush.bf16.msra.mxu0 %v2382_v63 }
 0x247   :  { %1686 = vmatpush.bf16.msra.mxu1 %v2357_v45 }
 0x248   :  { %1808 = vmatpush.bf16.msrb.mxu3 %v2373_v12 }
 0x249   :  { %1869 = vmatpush.bf16.msra.mxu0 %v2381_v33 }
 0x24b   :  { %1687 = vmatpush.bf16.msra.mxu1 %v2356_v21 }
 0x24c   :  { %1809 = vmatpush.bf16.msrb.mxu3 %v2372_v0 }
 0x24d   :  { %1870 = vmatpush.bf16.msra.mxu0 %v2380_v40 }
 0x2b8   :  { %v1207_v5 = vpop.xlane.xlu2 %1206 }
 0x2b9   :  { %2591 = vrcp.f32 %v1207_v5 }
 0x2bf   :  { %v2592_v44 = vpop.eup %2591 }
 0x2c0   :  { %v1209_v37 = vmul.f32 %v2592_v44, %v3465_v61  ;;  %v2367_v61 = vld [vmem:[%s3713_s5 + $0x158] sm:$0xff] }
 0x2c1   :  { %1745 = vmatpush.bf16.msrb.mxu2 %v2367_v61 }
 0x2c2   :  { %v3576_v9 = vmul.f32 %v1230_v23, %v1209_v37  ;;  %v1210_v53 = vadd.f32 %v2599_v51, %v1209_v37  ;;  %v2522_v23 = vld [vmem:[%s3719_s11] ss:$0 sm:$0xff] }
 0x2c4   :  { %1232 = vadd.xlane.f32.xlu0 %v3576_v9  ;;  %1211 = vst [vmem:[#allocation7] sm:$0xff] %v1210_v53 }
 0x2c5   :  { %1746 = vmatpush.bf16.msrb.mxu2 %v2366_v27 }
 0x2c9   :  { %1747 = vmatpush.bf16.msrb.mxu2 %v2365_v26 }
 0x2cd   :  { %1748 = vmatpush.bf16.msrb.mxu2 %v2364_v50 }
 0x337   :  { %v1233_v52 = vpop.xlane.xlu0 %1232 }
 0x338   :  { %2593 = vrcp.f32 %v1233_v52 }
 0x33e   :  { %v2594_v19 = vpop.eup %2593 }
 0x33f   :  { %v1235_v7 = vmul.f32 %v2594_v19, %v3576_v9 }
 0x341   :  { %1236 = vst [vmem:[#allocation5] sm:$0xff] %v1235_v7  ;;  %v1252_v13 = vpack.c.bf16 %v1235_v7, %v1235_v7  ;;  %v1238_v48 = vrot.slane %v1235_v7, 1  ;;  %v1239_v49 = vrot.slane %v1235_v7, 2  ;;  %v1240_v57 = vrot.slane %v1235_v7, 3 }
 0x342   :  { %v1241_v39 = vrot.slane %v1235_v7, 4  ;;  %v1242_v47 = vrot.slane %v1235_v7, 5  ;;  %v1243_v25 = vrot.slane %v1235_v7, 6  ;;  %v1244_v59 = vrot.slane %v1235_v7, 7  ;;  %1996 = dma.vmem_to_hbm [thread:$0]  %s1992_s24, 128, %s1994_s27, [#allocation6]  }
 0x343   :  { %1444 = vmatmul.bf16.vlgmr.msrb.gmra.mxu1 %v1252_v13  ;;  %v1253_v15 = vpack.c.bf16 %v1238_v48, %v1238_v48  ;;  %v1254_v22 = vpack.c.bf16 %v1239_v49, %v1239_v49  ;;  %v1255_v56 = vpack.c.bf16 %v1240_v57, %v1240_v57  ;;  %2007 = dma.vmem_to_hbm [thread:$0]  %s2003_s15, 128, %s2005_s0, [#allocation6]  }
 0x344   :  { %v1256_v58 = vpack.c.bf16 %v1241_v39, %v1241_v39  ;;  %v1257_v43 = vpack.c.bf16 %v1242_v47, %v1242_v47  ;;  %v1258_v5 = vpack.c.bf16 %v1243_v25, %v1243_v25  ;;  %v1259_v62 = vpack.c.bf16 %v1244_v59, %v1244_v59  ;;  %v1946_v25 = vpop.xlane.xlu1 %1945  ;;  %v2524_v59 = vld [vmem:[#allocation2] ss:$0 sm:$0xff] }
 0x345   :  { %1505 = vmatmul.bf16.vlgmr.msra.gmra.mxu2 %v1253_v15  ;;  %1566 = vmatmul.bf16.vlgmr.msra.gmra.mxu3 %v1254_v22 }
 0x346   :  { %1627 = vmatmul.bf16.vlgmr.msrb.gmra.mxu0 %v1255_v56 }
 0x353   :  { %1688 = vmatmul.bf16.vlgmr.msra.gmra.mxu1 %v1256_v58 }
 0x355   :  { %1749 = vmatmul.bf16.vlgmr.msrb.gmra.mxu2 %v1257_v43  ;;  %1810 = vmatmul.bf16.vlgmr.msrb.gmra.mxu3 %v1258_v5 }
 0x356   :  { %1871 = vmatmul.bf16.vlgmr.msra.gmra.mxu0 %v1259_v62 }
 0x3c0   :  { %v1445_v2 = vpop.f32.mrf.mxu1 }
 0x3c1   :  { %v1905_v11 = vmul.f32 %v2522_v23, %v1445_v2 }
 0x3c3   :  { %v1628_v8 = vpop.f32.mrf.mxu0 }
 0x3c4   :  { %v1908_v14 = vmul.f32 %v2522_v23, %v1628_v8  ;;  %v1888_v20 = vrot.slane %v1628_v8, 5 }
 0x3c6   :  { %v1925_v24 = vrot.slane %v1908_v14, 5 }
 0x3c8   :  { %v1447_v44 = vpop.f32.mrf.mxu1  ;;  %v1506_v17 = vpop.f32.mrf.mxu2 }
 0x3c9   :  { %v1567_v32 = vpop.f32.mrf.mxu3  ;;  %v1906_v55 = vmul.f32 %v2522_v23, %v1506_v17  ;;  %v1884_v42 = vrot.slane %v1506_v17, 7 }
 0x3ca   :  { %v1907_v41 = vmul.f32 %v2522_v23, %v1567_v32  ;;  %v1886_v29 = vrot.slane %v1567_v32, 6 }
 0x3cb   :  { %v1630_v37 = vpop.f32.mrf.mxu0  ;;  %v1921_v51 = vrot.slane %v1906_v55, 7  ;;  %v1885_v30 = vsel %vm1185_vm13, %v1884_v42, %v1445_v2 }
 0x3cc   :  { %v1923_v28 = vrot.slane %v1907_v41, 6  ;;  %v1887_v54 = vsel %vm1187_vm14, %v1886_v29, %v1885_v30 }
 0x3cd   :  { %v1922_v31 = vsel %vm1185_vm13, %v1921_v51, %v1905_v11  ;;  %v1889_v35 = vsel %vm1189_vm15, %v1888_v20, %v1887_v54 }
 0x3ce   :  { %v1924_v46 = vsel %vm1187_vm14, %v1923_v28, %v1922_v31 }
 0x3cf   :  { %v1926_v52 = vsel %vm1189_vm15, %v1925_v24, %v1924_v46 }
 0x3d0   :  { %v1508_v9 = vpop.f32.mrf.mxu2  ;;  %v1689_v60 = vpop.f32.mrf.mxu1 }
 0x3d1   :  { %v1569_v53 = vpop.f32.mrf.mxu3  ;;  %v1909_v36 = vmul.f32 %v2522_v23, %v1689_v60  ;;  %v1890_v18 = vrot.slane %v1689_v60, 4 }
 0x3d3   :  { %v1872_v34 = vpop.f32.mrf.mxu0  ;;  %v1927_v61 = vrot.slane %v1909_v36, 4  ;;  %v1891_v26 = vsel %vm1191_vm1, %v1890_v18, %v1889_v35 }
 0x3d4   :  { %v1912_v27 = vmul.f32 %v2522_v23, %v1872_v34  ;;  %v1896_v21 = vrot.slane %v1872_v34, 1 }
 0x3d5   :  { %v1928_v19 = vsel %vm1191_vm1, %v1927_v61, %v1926_v52 }
 0x3d6   :  { %v1933_v48 = vrot.slane %v1912_v27, 1 }
 0x3d8   :  { %v1691_v10 = vpop.f32.mrf.mxu1  ;;  %v1750_v38 = vpop.f32.mrf.mxu2 }
 0x3d9   :  { %v1892_v16 = vrot.slane %v1750_v38, 3  ;;  %v1910_v63 = vmul.f32 %v2522_v23, %v1750_v38  ;;  %v1811_v45 = vpop.f32.mrf.mxu3 }
 0x3da   :  { %v1894_v12 = vrot.slane %v1811_v45, 2  ;;  %v1911_v33 = vmul.f32 %v2522_v23, %v1811_v45 }
 0x3db   :  { %v1893_v50 = vsel %vm1193_vm2, %v1892_v16, %v1891_v26  ;;  %v1929_v0 = vrot.slane %v1910_v63, 3  ;;  %v1874_v40 = vpop.f32.mrf.mxu0 }
 0x3dc   :  { %v1931_v7 = vrot.slane %v1911_v33, 2  ;;  %v1895_v13 = vsel %vm1195_vm3, %v1894_v12, %v1893_v50 }
 0x3dd   :  { %v1930_v49 = vsel %vm1193_vm2, %v1929_v0, %v1928_v19  ;;  %v1897_v57 = vsel %vm1197_vm4, %v1896_v21, %v1895_v13 }
 0x3de   :  { %v1932_v15 = vsel %vm1195_vm3, %v1931_v7, %v1930_v49  ;;  %1900 = vst.msk [vmem:[#allocation3] sm:$0xff] %vm1899_vm0, %v1897_v57 }
 0x3df   :  { %v1934_v22 = vsel %vm1197_vm4, %v1933_v48, %v1932_v15  ;;  %1985 = dma.vmem_to_hbm [thread:$0]  %s1981_s26, 128, %s1983_s4, [#allocation4]  }
 0x3e0   :  { %v1752_v56 = vpop.f32.mrf.mxu2  ;;  %v1936_v39 = vsel %vm1899_vm0, %v1934_v22, 0.0 }
 0x3e1   :  { %v1813_v47 = vpop.f32.mrf.mxu3  ;;  %1937 = vadd.xlane.f32.xlu2 %v1936_v39 }
 0x454   :  { %v1938_v58 = vpop.xlane.xlu2 %1937 }
 0x455   :  { %v1947_v43 = vadd.f32 %v1946_v25, %v1938_v58 }
 0x457   :  { %v1952_v5 = vadd.f32 %v2524_v59, %v1947_v43 }
 0x459   :  { %v2323_v62 = vmul.f32 -1.442695, %v1952_v5 }
 0x45b   :  { %2595 = vpow2.f32 %v2323_v62 }
 0x461   :  { %v2596_v2 = vpop.eup %2595 }
 0x462   :  { %v1957_v3 = vadd.f32 1.0, %v2596_v2 }
 0x464   :  { %2597 = vrcp.f32 %v1957_v3  ;;  %v1969_v4 = vand.u32 2147483648, %v1957_v3  ;;  %v1967_v17 = vand.u32 2147483647, %v1957_v3  ;;  %vm1963_vm8 = vweird.f32 %v1957_v3 }
 0x466   :  { %v1970_v23 = vor.u32 1.1754944e-38, %v1969_v4  ;;  %vm1968_vm11 = vcmp.eq.f32.partialorder %v1967_v17, 8.507059e+37 }
 0x46a   :  { %v2598_v8 = vpop.eup %2597 }
 0x46b   :  { %v1959_v6 = vmul.f32 %v2598_v8, %v1957_v3  ;;  %vm1964_vm7 = vweird.f32 %v2598_v8 }
 0x46c   :  { %vm1965_vm10 = vmor %vm1963_vm8, %vm1964_vm7 }
 0x46d   :  { %v1960_v1 = vsub.f32 1.0, %v1959_v6 }
 0x46f   :  { %v1961_v44 = vmul.f32 %v2598_v8, %v1960_v1 }
 0x471   :  { %v1962_v32 = vadd.f32 %v2598_v8, %v1961_v44 }
 0x473   :  { %v1966_v37 = vsel %vm1965_vm10, %v2598_v8, %v1962_v32 }
 0x474   :  { %v1971_v55 = vsel %vm1968_vm11, %v1970_v23, %v1966_v37 }
 0x475   :  { %1974 = vst.msk [vmem:[%s3725_s17] sm:$0xff] %vm1973_vm9, %v1971_v55 }
 0x476   :  { %2673 = dma.done.wait [#allocation4], 128  }
 0x477   :  { %2674 = vsyncadd [#allocation4], 4294967168 }
 0x478   :  { %2675 = dma.done.wait [#allocation6], 256  }
 0x479   :  { %2676 = vsyncadd [#allocation6], 4294967040 }
 0x47a   :  { %2024 = vsyncpa [#allocation4], 1 }
 0x47b   :  { %2025 = vsyncpa [#allocation6], 1 }

</bundles_post_ra>
